<compile_context>
chip_gen: v5e
topology: v5e:2x2
jax: 0.10.0
libtpu: 0.0.40
codegen_flags: <defaults>
</compile_context>

<pallas_src>
import math

import jax
import jax.numpy as jnp
from jax.experimental import pallas as pl
from jax.experimental.pallas import tpu as pltpu


# ----------------------------- kernels -------------------------------------


def softmax_lane_kernel(x_ref, o_ref):
    """Softmax over the last (lane) axis of a (block_rows, D) tile."""
    m = jnp.max(x_ref[...], axis=-1, keepdims=True).astype(jnp.float32)   # XLU, input dtype
    e = jnp.exp(x_ref[...].astype(jnp.float32) - m)                        # EUP, only f32 tile
    s = jnp.sum(e, axis=-1, keepdims=True)                                 # XLU
    inv = pl.reciprocal(s)                                                 # exact, (rows, 1) only
    o_ref[...] = (e * inv).astype(o_ref.dtype)                             # lane-dense store


def softmax_sublane_kernel(x_ref, o_ref):
    """Softmax over axis=-2 (sublanes) of a (1, S, block_cols) tile."""
    m = jnp.max(x_ref[...], axis=-2, keepdims=True).astype(jnp.float32)
    e = jnp.exp(x_ref[...].astype(jnp.float32) - m)
    s = jnp.sum(e, axis=-2, keepdims=True)
    inv = pl.reciprocal(s)                                                 # exact, (1, 1, cols)
    o_ref[...] = (e * inv).astype(o_ref.dtype)


# ----------------------------- tiling helpers -------------------------------


_TILE_TARGET_BYTES = 2 * 1024 * 1024  # ~2 MiB input tile -> near HBM roofline


def _vmem_budget_bytes() -> int:
    """Generation-aware VMEM budget (leave headroom for compiler scratch)."""
    cap = 64 * 1024 * 1024  # conservative fallback = v7x physical per-TC VMEM
    try:
        info = pltpu.get_tpu_info()
        cap = int(getattr(info, "vmem_capacity_bytes", cap))
    except Exception:
        pass
    return max(8 * 1024 * 1024, int(cap * 0.6))


def _sublane_multiple(itemsize: int) -> int:
    """Packed sublane tile height: 8 for f32, 16 for bf16, 32 for int8/fp8."""
    return max(8, 32 // max(itemsize, 1))


def _pick_block_rows(n_rows: int, d: int, itemsize: int, budget: int) -> int:
    """Row tile for the lane-reduce kernel: big, budget-aware, >=2 grid steps."""
    sub = _sublane_multiple(itemsize)
    if n_rows <= sub:
        return n_rows                                   # full-extent block (always legal)
    target_rows = _TILE_TARGET_BYTES // max(d * itemsize, 1)
    # footprint/row: double-buffered in+out tiles + ~2 f32 intermediate tiles
    per_row_bytes = d * (4 * itemsize + 2 * 4)
    budget_rows = budget // max(per_row_bytes, 1)
    br = min(n_rows, max(sub, min(target_rows, budget_rows)))
    if br >= n_rows:                                    # keep >=2 steps for megacore (v7x)
        br = pl.cdiv(n_rows, 2)
    br = max(sub, (br // sub) * sub)
    return min(br, n_rows)


def _pick_block_cols(n_pre: int, n_post: int, s: int, itemsize: int, budget: int) -> int:
    """Lane tile for the sublane-reduce kernel: multiple of 128, budget-aware."""
    if n_post <= 128:
        return n_post                                   # full-extent block (always legal)
    target_cols = _TILE_TARGET_BYTES // max(s * itemsize, 1)
    per_col_bytes = s * (4 * itemsize + 2 * 4)
    budget_cols = budget // max(per_col_bytes, 1)
    bc = min(n_post, max(128, min(target_cols, budget_cols)))
    if n_pre == 1 and bc >= n_post:                     # keep >=2 total grid steps
        bc = pl.cdiv(n_post, 2)
    bc = max(128, (bc // 128) * 128)
    return min(bc, n_post)


# ----------------------------- wrapper --------------------------------------


def pallas_softmax(x: jax.Array, dim: int) -> jax.Array:
    ndim = x.ndim
    dim = dim % ndim
    itemsize = jnp.dtype(x.dtype).itemsize
    budget = _vmem_budget_bytes()

    n_pre = math.prod(x.shape[:dim]) if dim > 0 else 1
    s_dim = x.shape[dim]
    n_post = math.prod(x.shape[dim + 1:]) if dim + 1 < ndim else 1

    if n_post == 1:
        # ---- lane-reduction path: softmax axis is (or collapses to) the last axis.
        x2 = x.reshape(n_pre, s_dim)
        n_rows, d = x2.shape
        block_rows = _pick_block_rows(n_rows, d, itemsize, budget)
        grid = (pl.cdiv(n_rows, block_rows),)

        io_bytes = 2 * 2 * block_rows * d * itemsize
        f32_bytes = 2 * block_rows * d * 4
        vmem_limit = int(min(budget, max(2 * (io_bytes + f32_bytes), 8 * 1024 * 1024)))

        out = pl.pallas_call(
            softmax_lane_kernel,
            out_shape=jax.ShapeDtypeStruct((n_rows, d), x.dtype),
            grid_spec=pltpu.PrefetchScalarGridSpec(
                num_scalar_prefetch=0,
                grid=grid,
                in_specs=[pl.BlockSpec((block_rows, d), lambda i: (i, 0))],
                out_specs=pl.BlockSpec((block_rows, d), lambda i: (i, 0)),
            ),
            compiler_params=pltpu.CompilerParams(
                dimension_semantics=("parallel",),
                vmem_limit_bytes=vmem_limit,
            ),
        )(x2)
        return out.reshape(x.shape)

    # ---- sublane-reduction path: no HBM transpose; reshape (free) to (pre, S, post)
    # and reduce over the sublane axis, blocking over the trailing lane axis.
    x3 = x.reshape(n_pre, s_dim, n_post)
    block_cols = _pick_block_cols(n_pre, n_post, s_dim, itemsize, budget)
    grid = (n_pre, pl.cdiv(n_post, block_cols))

    io_bytes = 2 * 2 * s_dim * block_cols * itemsize
    f32_bytes = 2 * s_dim * block_cols * 4
    vmem_limit = int(min(budget, max(2 * (io_bytes + f32_bytes), 8 * 1024 * 1024)))

    out = pl.pallas_call(
        softmax_sublane_kernel,
        out_shape=jax.ShapeDtypeStruct((n_pre, s_dim, n_post), x.dtype),
        grid_spec=pltpu.PrefetchScalarGridSpec(
            num_scalar_prefetch=0,
            grid=grid,
            in_specs=[pl.BlockSpec((1, s_dim, block_cols), lambda i, j: (i, 0, j))],
            out_specs=pl.BlockSpec((1, s_dim, block_cols), lambda i, j: (i, 0, j)),
        ),
        compiler_params=pltpu.CompilerParams(
            dimension_semantics=("parallel", "parallel"),
            vmem_limit_bytes=vmem_limit,
        ),
    )(x3)
    return out.reshape(x.shape)


def reference_softmax(x: jax.Array, dim: int) -> jax.Array:
    """Pure-JAX mirror of the PyTorch module's forward."""
    e = jnp.exp(x - jnp.max(x, axis=dim, keepdims=True))
    return e / jnp.sum(e, axis=dim, keepdims=True)


if __name__ == "__main__":
    key = jax.random.PRNGKey(0)
    # (batch, seq, features) with a lane-dense (multiple-of-128) trailing dim.
    x = jax.random.normal(key, (2, 512, 128), jnp.float32)

    # Softmax over the last dim (lane-reduction kernel).
    out = pallas_softmax(x, dim=-1)
    out = jax.block_until_ready(out)
    ref = reference_softmax(x, dim=-1)
    assert out.shape == x.shape
    assert jnp.allclose(out, ref, atol=1e-5, rtol=1e-5), "mismatch vs reference (dim=-1)"

    # Softmax over a middle dim (sublane-reduction kernel, no HBM transpose).
    out1 = pallas_softmax(x, dim=1)
    out1 = jax.block_until_ready(out1)
    ref1 = reference_softmax(x, dim=1)
    assert jnp.allclose(out1, ref1, atol=1e-5, rtol=1e-5), "mismatch vs reference (dim=1)"

    # Softmax over the leading dim (sublane kernel with pre=1, lane blocking).
    out0 = pallas_softmax(x, dim=0)
    out0 = jax.block_until_ready(out0)
    ref0 = reference_softmax(x, dim=0)
    assert jnp.allclose(out0, ref0, atol=1e-5, rtol=1e-5), "mismatch vs reference (dim=0)"

    print("KERNEL_OK")
</pallas_src>

<mosaic_0001>
module attributes {stable_mosaic.version = 11 : i64} {
  func.func @softmax_lane_kernel(%arg0: i32, %arg1: memref<512x128xf32, #tpu.memory_space<vmem>>, %arg2: memref<512x128xf32, #tpu.memory_space<vmem>>) attributes {dimension_semantics = [#tpu.dimension_semantics<parallel>], iteration_bounds = array<i64: 2>, scalar_prefetch = 0 : i64, scratch_operands = 0 : i64, tpu.core_type = #tpu.core_type<tc>, window_params = [{transform_indices = @transform_0, window_bounds = array<i64: 512, 128>}, {transform_indices = @transform_1, window_bounds = array<i64: 512, 128>}]} {
    %c0 = arith.constant 0 : index
    %c0_0 = arith.constant 0 : index
    %0 = vector.load %arg1[%c0, %c0_0] : memref<512x128xf32, #tpu.memory_space<vmem>>, vector<512x128xf32>
    %cst = arith.constant dense<0xFF800000> : vector<512xf32>
    %1 = vector.multi_reduction <maximumf>, %0, %cst [1] : vector<512x128xf32> to vector<512xf32>
    %2 = vector.shape_cast %1 : vector<512xf32> to vector<512x1xf32>
    %c0_1 = arith.constant 0 : index
    %c0_2 = arith.constant 0 : index
    %3 = vector.load %arg1[%c0_1, %c0_2] : memref<512x128xf32, #tpu.memory_space<vmem>>, vector<512x128xf32>
    %4 = vector.broadcast %2 : vector<512x1xf32> to vector<512x128xf32>
    %5 = arith.subf %3, %4 : vector<512x128xf32>
    %6 = math.exp %5 : vector<512x128xf32>
    %cst_3 = arith.constant dense<0.000000e+00> : vector<512xf32>
    %7 = vector.multi_reduction <add>, %6, %cst_3 [1] : vector<512x128xf32> to vector<512xf32>
    %8 = vector.shape_cast %7 : vector<512xf32> to vector<512x1xf32>
    %9 = tpu.reciprocal %8 : vector<512x1xf32> -> vector<512x1xf32>
    %10 = vector.broadcast %9 : vector<512x1xf32> to vector<512x128xf32>
    %11 = arith.mulf %6, %10 : vector<512x128xf32>
    %c0_4 = arith.constant 0 : index
    %c0_5 = arith.constant 0 : index
    %12 = vector.load %arg2[%c0_4, %c0_5] : memref<512x128xf32, #tpu.memory_space<vmem>>, vector<512x128xf32>
    tpu.vector_store %arg2[%c0_4, %c0_5], %11 {strides = array<i32>} : memref<512x128xf32, #tpu.memory_space<vmem>>, vector<512x128xf32>,
    return
  }
  func.func @transform_0(%arg0: i32) -> (i32, i32) {
    %c0_i32 = arith.constant 0 : i32
    %c0_i32_0 = arith.constant 0 : i32
    return %arg0, %c0_i32 : i32, i32
  }
  func.func @transform_1(%arg0: i32) -> (i32, i32) {
    %c0_i32 = arith.constant 0 : i32
    %c0_i32_0 = arith.constant 0 : i32
    return %arg0, %c0_i32 : i32, i32
  }
}

</mosaic_0001>

<bundles_post_ra>
// kernel: tpu_custom_call.1
= control target key start
LH: loop header
LB: loop body
LE: loop exit
PB: predicated region body
PF: predicated region fallthrough
CT: control target
= control target key end

     0   :  { %6 = vsyncpa [#allocation3], 0  ;;  %s4071_s0 = inlined_call_operand.hbm [shape: f32[1024,128], index: 0, kind: input, shape index: {}]   ;;  %s4072_s1 = inlined_call_operand.hbm [shape: f32[1024,128], index: 1, kind: output, shape index: {}]  }
   0x1   :  { %8 = vsyncpa [#allocation3 + $0x1], 0 }
   0x2   :  { %9 = vsyncpa [#allocation4], 0 }
   0x3   :  { %11 = vsyncpa [#allocation4 + $0x1], 0  ;;  %s2198_s6 = smov 0   ;;  %s2200_s7 = smov 0  }
   0x4   :  { %s2202_s8 = smov 0   ;;  %s2204_s9 = smov 0  }
   0x5 LB: > { %s2219_s10 = sadd.s32 4294967295, %s2182_s9   ;;  %s1764_s11 = sadd.s32 4294967294, %s2182_s9   ;;  %s2182_s9 = sphi %s2204_s9, %s4347_s9   ;;  %s2178_s8 = sphi %s2202_s8, %s4346_s8   ;;  %s2174_s7 = sphi %s2200_s7, %s4345_s7   ;;  %s2170_s6 = sphi %s2198_s6, %s4344_s6  }
   0x6   : > { %s2223_s12 = sadd.s32 1, %s2182_s9   ;;  %s24_s13 = sadd.s32 1, %s2178_s8 }
   0x7   : > { %s21_s14 = ssub.s32 %s2182_s9, %s2223_s12  ;;  %p31_p0 = scmp.ne.s32.totalorder %s2178_s8, %s2174_s7 }
   0x8   : > { %p22_p1 = scmp.eq.s32.totalorder %s21_s14, 0  ;;  %p32_p2 = scmp.eq.s32.totalorder %s2182_s9, 0 }
   0x9   : > { %p37_p3 = scmp.ne.s32.totalorder %s2174_s7, %s2170_s6  ;;  %p38_p4 = scmp.eq.s32.totalorder %s2219_s10, 0 }
   0xa   : > { %s2235_s15 = scalar_select %p22_p1, %s2178_s8, %s24_s13  }
   0xb   : > { %p2237_p5 = por %p32_p2, %p31_p0  ;;  %p2241_p6 = por %p38_p4, %p37_p3 }
   0xc   : > { %p61_p7 = scmp.eq.s32.totalorder %s2219_s10, 1  ;;  %p67_p8 = scmp.eq.s32.totalorder %s1764_s11, 1 }
   0xd   : > { %p1792_p10 = scmp.lt.s32.totalorder %s2182_s9, 2  ;;  %s87_s20 = sand.u32 1, %s2178_s8  }
   0xe   : > { %p2248_p11 = por %p61_p7, %p31_p0  ;;  %p2252_p12 = por %p67_p8, %p37_p3 }
   0xf   : > { %s1778_s21 = sshll.u32 %s2182_s9, 9  ;;  %s1767_s22 = sshll.u32 %s87_s20, 9 }
  0x10   : > { %s96_s25 = scalar_lea.hbm %s4071_s0, %s1778_s21  ;;  %s91_s27 = scalar_lea.vmem [#allocation2], %s1767_s22 }
  0x11   : > { %s97_s26 = sshll.u32 %s96_s25, 4  ;;  %s99_s28 = sshll.u32 %s91_s27, 4  ;;  %s98_s26 = int_to_ptr.hbm [resolvable:$true] %s97_s26  ;;  %s100_s28 = int_to_ptr.vmem [resolvable:$true] %s99_s28 }
  0x12   : > { %p2263_p13 = pnand %p1792_p10, %p2237_p5  ;;  %p1770_p0 = scmp.ge.s32.totalorder %s2182_s9, 1 }
  0x13   : > { %p107_p1 = scmp.lt.s32.totalorder %s2182_s9, 3  ;;  %s88_s30 = scalar_lea.sflag [#allocation3], %s87_s20 }
  0x14   : > { %s2086_s2 = sshra.s32 %s98_s26, 4  ;;  %p2090_p3 = pneg %p2263_p13  ;;  %s2087_s2 = int_to_ptr.hbm [resolvable:$true] %s2086_s2 }
  0x15   : > { %s2088_s3 = scalar_lea.hbm %s2087_s2, 512  ;;  %s2093_s11 = scalar_lea.hbm %s4071_s0, 1024 }
  0x16   : > { %p2089_p2 = scmp.ne.s32.totalorder %s2087_s2, %s2088_s3  ;;  %p2094_p5 = scmp.lt.s32.totalorder %s2087_s2, %s4071_s0 }
  0x17   : > { %p2095_p8 = scmp.lt.s32.totalorder %s2093_s11, %s2088_s3 }
  0x18   : > { %p2091_p4 = pnand %p2090_p3, %p2089_p2 }
  0x19   : > { %p2096_p10 = por %p2095_p8, %p2094_p5 }
  0x1a   : > { %p2092_p7 = pneg %p2091_p4 }
  0x1c   : > { %p2097_p9 = pnand %p2096_p10, %p2092_p7 }
  0x1e   : > { %2100 = shalt.err (!%p2097_p9)
}
  0x1f   : > { %s2184_s16 = smov 128   ;;  %s2185_s20 = smov 8  }
  0x20   : > { %1787 = dma.hbm_to_vmem [thread:$0]  (!%p2263_p13), %s98_s26, 8192, %s100_s28, %s88_s30, %s2184_s16, %s2184_s16, %s2185_s20  }
  0x21   : > { %p108_p2 = pnand %p1770_p0, %p107_p1 }
  0x23   : > { %111 = sbr.rel (%p108_p2) target bundleno = 571 (0x23b), region = 24 }
  0x28   : > { %s2284_s21 = sand.u32 1, %s2174_s7  }
  0x29   : > { %s1771_s22 = sshll.u32 %s2284_s21, 9  ;;  %s114_s23 = scalar_lea.sflag [#allocation3], %s2284_s21 }
  0x2a   : > { %s2290_s24 = scalar_lea.vmem [#allocation2], %s1771_s22 }
  0x2b   : > { %2161 = dma.done.wait (%p2241_p6), %s114_s23, 8192  }
  0x2c   : > { %2163 = vsyncadd (%p2241_p6), %s114_s23, 4294959104  ;;  %v2297_v0 = vld [vmem:[%s2290_s24 + $0x20] sm:$0xff]  ;;  %v2300_v1 = vld [vmem:[%s2290_s24 + $0x10] sm:$0xff]  ;;  %s3026_s17 = scalar_lea.vmem [#allocation5], %s1771_s22  ;;  %s1779_s25 = sshll.u32 %s2219_s10, 9 }
  0x2d   : > { %v2303_v2 = vld [vmem:[%s2290_s24] sm:$0xff]  ;;  %211 = vmax.xlane.f32.xlu2 %v2297_v0  ;;  %207 = vmax.xlane.f32.xlu1 %v2300_v1  ;;  %v2309_v3 = vld [vmem:[%s2290_s24 + $0x28] sm:$0xff]  ;;  %v2312_v4 = vld [vmem:[%s2290_s24 + $0x18] sm:$0xff]  ;;  %s1687_s28 = scalar_lea.hbm %s4072_s1, %s1779_s25  ;;  %s1688_s10 = sshll.u32 %s3026_s17, 4  ;;  %s1689_s10 = int_to_ptr.vmem [resolvable:$true] %s1688_s10 }
  0x2e   : > { %203 = vmax.xlane.f32.xlu0 %v2303_v2  ;;  %v2315_v5 = vld [vmem:[%s2290_s24 + $0x8] sm:$0xff]  ;;  %v2321_v6 = vld [vmem:[%s2290_s24 + $0x40] sm:$0xff]  ;;  %v2324_v7 = vld [vmem:[%s2290_s24 + $0x38] sm:$0xff]  ;;  %s1690_s29 = sshll.u32 %s1687_s28, 4  ;;  %s1676_s30 = scalar_lea.sflag [#allocation4], %s2284_s21  ;;  %s1691_s29 = int_to_ptr.hbm [resolvable:$true] %s1690_s29 }
  0x2f   : > { %v2327_v8 = vld [vmem:[%s2290_s24 + $0x30] sm:$0xff]  ;;  %v2333_v9 = vld [vmem:[%s2290_s24 + $0x58] sm:$0xff]  ;;  %v2339_v11 = vld [vmem:[%s2290_s24 + $0x48] sm:$0xff]  ;;  %s2130_s2 = sshra.s32 %s1691_s29, 4  ;;  %s2136_s11 = scalar_lea.hbm %s4072_s1, 1024  ;;  %s2131_s2 = int_to_ptr.hbm [resolvable:$true] %s2130_s2 }
  0x30   : > { %v2336_v10 = vld [vmem:[%s2290_s24 + $0x50] sm:$0xff]  ;;  %v2348_v13 = vld [vmem:[%s2290_s24 + $0x68] sm:$0xff]  ;;  %v2351_v14 = vld [vmem:[%s2290_s24 + $0x60] sm:$0xff]  ;;  %s2132_s3 = scalar_lea.hbm %s2131_s2, 512  ;;  %p2137_p0 = scmp.lt.s32.totalorder %s2131_s2, %s4072_s1 }
  0x31   : > { %v2345_v12 = vld [vmem:[%s2290_s24 + $0x70] sm:$0xff]  ;;  %v2357_v15 = vld [vmem:[%s2290_s24 + $0x88] sm:$0xff]  ;;  %v2360_v16 = vld [vmem:[%s2290_s24 + $0x80] sm:$0xff]  ;;  %p2133_p6 = scmp.ne.s32.totalorder %s2131_s2, %s2132_s3  ;;  %p2138_p1 = scmp.lt.s32.totalorder %s2136_s11, %s2132_s3 }
  0x32   : > { %v2363_v17 = vld [vmem:[%s2290_s24 + $0x78] sm:$0xff]  ;;  %v2369_v18 = vld [vmem:[%s2290_s24 + $0xa0] sm:$0xff]  ;;  %v2375_v20 = vld [vmem:[%s2290_s24 + $0x90] sm:$0xff] }
  0x33   : > { %v2372_v19 = vld [vmem:[%s2290_s24 + $0x98] sm:$0xff]  ;;  %v2384_v22 = vld [vmem:[%s2290_s24 + $0xb0] sm:$0xff]  ;;  %v2387_v23 = vld [vmem:[%s2290_s24 + $0xa8] sm:$0xff]  ;;  %p2134_p9 = pnand %p2133_p6, %p2248_p11  ;;  %p2139_p3 = por %p2138_p1, %p2137_p0 }
  0x34   : > { %v2381_v21 = vld [vmem:[%s2290_s24 + $0xb8] sm:$0xff]  ;;  %v2393_v24 = vld [vmem:[%s2290_s24 + $0xd0] sm:$0xff]  ;;  %v2396_v25 = vld [vmem:[%s2290_s24 + $0xc8] sm:$0xff] }
  0x35   : > { %213 = vmax.xlane.f32.xlu2 %v2309_v3  ;;  %209 = vmax.xlane.f32.xlu1 %v2312_v4  ;;  %v2399_v26 = vld [vmem:[%s2290_s24 + $0xc0] sm:$0xff]  ;;  %v2405_v27 = vld [vmem:[%s2290_s24 + $0xe8] sm:$0xff]  ;;  %v2411_v29 = vld [vmem:[%s2290_s24 + $0xd8] sm:$0xff]  ;;  %p2135_p13 = pneg %p2134_p9 }
  0x36   : > { %205 = vmax.xlane.f32.xlu0 %v2315_v5  ;;  %v2408_v28 = vld [vmem:[%s2290_s24 + $0xe0] sm:$0xff]  ;;  %v2420_v31 = vld [vmem:[%s2290_s24 + $0xf8] sm:$0xff]  ;;  %v2423_v32 = vld [vmem:[%s2290_s24 + $0xf0] sm:$0xff] }
  0x37   : > { %v2417_v30 = vld [vmem:[%s2290_s24 + $0x100] sm:$0xff]  ;;  %v2429_v33 = vld [vmem:[%s2290_s24 + $0x118] sm:$0xff]  ;;  %v2432_v34 = vld [vmem:[%s2290_s24 + $0x110] sm:$0xff]  ;;  %p2140_p4 = pnand %p2139_p3, %p2135_p13 }
  0x38   : > { %4127 = vst [vmem:[#allocation8_spill] sm:$0xff] %v2429_v33  ;;  %v2435_v35 = vld [vmem:[%s2290_s24 + $0x108] sm:$0xff]  ;;  %v2441_v36 = vld [vmem:[%s2290_s24 + $0x130] sm:$0xff]  ;;  %v2447_v38 = vld [vmem:[%s2290_s24 + $0x120] sm:$0xff] }
  0x39   : > { %4128 = vst [vmem:[#allocation9_spill] sm:$0xff] %v2441_v36  ;;  %v2444_v37 = vld [vmem:[%s2290_s24 + $0x128] sm:$0xff]  ;;  %v2456_v40 = vld [vmem:[%s2290_s24 + $0x140] sm:$0xff]  ;;  %v2459_v41 = vld [vmem:[%s2290_s24 + $0x138] sm:$0xff] }
  0x3a   : > { %v2453_v39 = vld [vmem:[%s2290_s24 + $0x148] sm:$0xff]  ;;  %4130 = vst [vmem:[#allocation11_spill] sm:$0xff] %v2456_v40  ;;  %v2465_v42 = vld [vmem:[%s2290_s24 + $0x160] sm:$0xff]  ;;  %v2468_v43 = vld [vmem:[%s2290_s24 + $0x158] sm:$0xff] }
  0x3b   : > { %4129 = vst [vmem:[#allocation10_spill] sm:$0xff] %v2453_v39  ;;  %v2471_v44 = vld [vmem:[%s2290_s24 + $0x150] sm:$0xff]  ;;  %v2481_v48 = vld [vmem:[%s2290_s24 + $0x178] sm:$0xff]  ;;  %v2487_v50 = vld [vmem:[%s2290_s24 + $0x168] sm:$0xff] }
  0x3c   : > { %4131 = vst [vmem:[#allocation12_spill] sm:$0xff] %v2459_v41  ;;  %v2484_v49 = vld [vmem:[%s2290_s24 + $0x170] sm:$0xff]  ;;  %v2498_v55 = vld [vmem:[%s2290_s24 + $0x188] sm:$0xff]  ;;  %v2501_v56 = vld [vmem:[%s2290_s24 + $0x180] sm:$0xff] }
  0x3d   : > { %219 = vmax.xlane.f32.xlu2 %v2321_v6  ;;  %217 = vmax.xlane.f32.xlu1 %v2324_v7  ;;  %4132 = vst [vmem:[#allocation13_spill] sm:$0xff] %v2465_v42  ;;  %v2495_v54 = vld [vmem:[%s2290_s24 + $0x190] sm:$0xff]  ;;  %v2513_v60 = vld [vmem:[%s2290_s24 + $0x1a8] sm:$0xff]  ;;  %v2516_v61 = vld [vmem:[%s2290_s24 + $0x1a0] sm:$0xff] }
  0x3e   : > { %215 = vmax.xlane.f32.xlu0 %v2327_v8  ;;  %4133 = vst [vmem:[#allocation14_spill] sm:$0xff] %v2468_v43  ;;  %v2519_v62 = vld [vmem:[%s2290_s24 + $0x198] sm:$0xff] }
  0x3f   : > { %4134 = vst [vmem:[#allocation15_spill] sm:$0xff] %v2471_v44 }
  0x40   : > { %4135 = vst [vmem:[#allocation16_spill] sm:$0xff] %v2481_v48 }
  0x41   : > { %4136 = vst [vmem:[#allocation17_spill] sm:$0xff] %v2484_v49 }
  0x42   : > { %4137 = vst [vmem:[#allocation18_spill] sm:$0xff] %v2487_v50 }
  0x43   : > { %4138 = vst [vmem:[#allocation19_spill] sm:$0xff] %v2495_v54 }
  0x44   : > { %4139 = vst [vmem:[#allocation20_spill] sm:$0xff] %v2498_v55 }
  0x45   : > { %225 = vmax.xlane.f32.xlu2 %v2333_v9  ;;  %223 = vmax.xlane.f32.xlu1 %v2336_v10  ;;  %4140 = vst [vmem:[#allocation21_spill] sm:$0xff] %v2501_v56 }
  0x46   : > { %221 = vmax.xlane.f32.xlu0 %v2339_v11  ;;  %4141 = vst [vmem:[#allocation22_spill] sm:$0xff] %v2513_v60 }
  0x47   : > { %4142 = vst [vmem:[#allocation23_spill] sm:$0xff] %v2516_v61 }
  0x48   : > { %4143 = vst [vmem:[#allocation24_spill] sm:$0xff] %v2519_v62 }
  0x4d   : > { %231 = vmax.xlane.f32.xlu2 %v2345_v12  ;;  %229 = vmax.xlane.f32.xlu1 %v2348_v13 }
  0x4e   : > { %227 = vmax.xlane.f32.xlu0 %v2351_v14 }
  0x55   : > { %237 = vmax.xlane.f32.xlu2 %v2357_v15  ;;  %235 = vmax.xlane.f32.xlu1 %v2360_v16 }
  0x56   : > { %233 = vmax.xlane.f32.xlu0 %v2363_v17 }
  0x5d   : > { %243 = vmax.xlane.f32.xlu2 %v2369_v18  ;;  %241 = vmax.xlane.f32.xlu1 %v2372_v19 }
  0x5e   : > { %239 = vmax.xlane.f32.xlu0 %v2375_v20 }
  0x65   : > { %249 = vmax.xlane.f32.xlu2 %v2381_v21  ;;  %247 = vmax.xlane.f32.xlu1 %v2384_v22 }
  0x66   : > { %245 = vmax.xlane.f32.xlu0 %v2387_v23 }
  0x6d   : > { %255 = vmax.xlane.f32.xlu2 %v2393_v24  ;;  %253 = vmax.xlane.f32.xlu1 %v2396_v25 }
  0x6e   : > { %251 = vmax.xlane.f32.xlu0 %v2399_v26 }
  0x75   : > { %261 = vmax.xlane.f32.xlu2 %v2405_v27  ;;  %259 = vmax.xlane.f32.xlu1 %v2408_v28 }
  0x76   : > { %257 = vmax.xlane.f32.xlu0 %v2411_v29 }
  0x7d   : > { %267 = vmax.xlane.f32.xlu2 %v2417_v30  ;;  %265 = vmax.xlane.f32.xlu1 %v2420_v31 }
  0x7e   : > { %263 = vmax.xlane.f32.xlu0 %v2423_v32 }
  0x85   : > { %273 = vmax.xlane.f32.xlu2 %v2429_v33  ;;  %271 = vmax.xlane.f32.xlu1 %v2432_v34  ;;  %v2572_v33 = vld [vmem:[%s2290_s24 + $0x1e8] sm:$0xff] }
  0x86   : > { %269 = vmax.xlane.f32.xlu0 %v2435_v35  ;;  %4149 = vst [vmem:[#allocation30_spill] sm:$0xff] %v2572_v33 }
  0x8d   : > { %279 = vmax.xlane.f32.xlu2 %v2441_v36  ;;  %277 = vmax.xlane.f32.xlu1 %v2444_v37 }
  0x8e   : > { %275 = vmax.xlane.f32.xlu0 %v2447_v38 }
  0x95   : > { %285 = vmax.xlane.f32.xlu2 %v2453_v39  ;;  %283 = vmax.xlane.f32.xlu1 %v2456_v40  ;;  %v2569_v40 = vld [vmem:[%s2290_s24 + $0x1f0] sm:$0xff] }
  0x96   : > { %281 = vmax.xlane.f32.xlu0 %v2459_v41 }
  0x9d   : > { %291 = vmax.xlane.f32.xlu2 %v2465_v42  ;;  %289 = vmax.xlane.f32.xlu1 %v2468_v43  ;;  %v2555_v43 = vld [vmem:[%s2290_s24 + $0x1c8] sm:$0xff] }
  0x9e   : > { %287 = vmax.xlane.f32.xlu0 %v2471_v44  ;;  %v2552_v44 = vld [vmem:[%s2290_s24 + $0x1d0] sm:$0xff]  ;;  %4148 = vst [vmem:[#allocation29_spill] sm:$0xff] %v2555_v43 }
  0x9f   : > { %4147 = vst [vmem:[#allocation28_spill] sm:$0xff] %v2552_v44 }
  0xa0   : > { %v2476_v45 = vpop.xlane.xlu2 %211  ;;  %v2478_v46 = vpop.xlane.xlu1 %207 }
  0xa1   : > { %v204_v47 = vpop.xlane.xlu0 %203 }
  0xa5   : > { %297 = vmax.xlane.f32.xlu2 %v2481_v48  ;;  %295 = vmax.xlane.f32.xlu1 %v2484_v49  ;;  %v2537_v49 = vld [vmem:[%s2290_s24 + $0x1b0] sm:$0xff]  ;;  %v2549_v48 = vld [vmem:[%s2290_s24 + $0x1d8] sm:$0xff] }
  0xa6   : > { %293 = vmax.xlane.f32.xlu0 %v2487_v50  ;;  %v2534_v50 = vld [vmem:[%s2290_s24 + $0x1b8] sm:$0xff]  ;;  %4146 = vst [vmem:[#allocation27_spill] sm:$0xff] %v2537_v49 }
  0xa7   : > { %4145 = vst [vmem:[#allocation26_spill] sm:$0xff] %v2534_v50 }
  0xa8   : > { %v2492_v51 = vpop.xlane.xlu2 %213  ;;  %v210_v52 = vpop.xlane.xlu1 %209 }
  0xa9   : > { %v206_v53 = vpop.xlane.xlu0 %205 }
  0xad   : > { %303 = vmax.xlane.f32.xlu2 %v2495_v54  ;;  %301 = vmax.xlane.f32.xlu1 %v2498_v55  ;;  %v2531_v54 = vld [vmem:[%s2290_s24 + $0x1c0] sm:$0xff] }
  0xae   : > { %299 = vmax.xlane.f32.xlu0 %v2501_v56  ;;  %4144 = vst [vmem:[#allocation25_spill] sm:$0xff] %v2531_v54 }
  0xb0   : > { %v2506_v57 = vpop.xlane.xlu2 %219  ;;  %v2508_v58 = vpop.xlane.xlu1 %217 }
  0xb1   : > { %v2510_v59 = vpop.xlane.xlu0 %215 }
  0xb5   : > { %309 = vmax.xlane.f32.xlu2 %v2513_v60  ;;  %307 = vmax.xlane.f32.xlu1 %v2516_v61 }
  0xb6   : > { %305 = vmax.xlane.f32.xlu0 %v2519_v62 }
  0xb8   : > { %v2524_v63 = vpop.xlane.xlu2 %225  ;;  %v2526_v56 = vpop.xlane.xlu1 %223 }
  0xb9   : > { %v2528_v55 = vpop.xlane.xlu0 %221 }
  0xbd   : > { %315 = vmax.xlane.f32.xlu2 %v2531_v54  ;;  %313 = vmax.xlane.f32.xlu1 %v2534_v50  ;;  %v331_v54 = vsub.f32 %v2303_v2, %v204_v47  ;;  %v2575_v2 = vld [vmem:[%s2290_s24 + $0x1e0] sm:$0xff]  ;;  %v334_v47 = vsub.f32 %v2312_v4, %v210_v52 }
  0xbe   : > { %311 = vmax.xlane.f32.xlu0 %v2537_v49  ;;  %v332_v49 = vsub.f32 %v2315_v5, %v206_v53  ;;  %v335_v5 = vsub.f32 %v2297_v0, %v2476_v45 }
  0xbf   : > { %v395_v39 = vmul.f32 1.442695, %v331_v54  ;;  %v401_v0 = vmul.f32 1.442695, %v334_v47 }
  0xc0   : > { %v2542_v61 = vpop.xlane.xlu2 %231  ;;  %v2544_v62 = vpop.xlane.xlu1 %229  ;;  %v397_v41 = vmul.f32 1.442695, %v332_v49  ;;  %v333_v49 = vsub.f32 %v2300_v1, %v2478_v46  ;;  %v337_v1 = vsub.f32 %v2327_v8, %v2510_v59  ;;  %v336_v46 = vsub.f32 %v2309_v3, %v2492_v51 }
  0xc1   : > { %v2546_v60 = vpop.xlane.xlu0 %227  ;;  %1830 = vpow2.f32 %v395_v39  ;;  %v341_v59 = vsub.f32 %v2336_v10, %v2526_v56  ;;  %v340_v3 = vsub.f32 %v2339_v11, %v2528_v55  ;;  %v339_v51 = vsub.f32 %v2321_v6, %v2506_v57 }
  0xc2   : > { %1832 = vpow2.f32 %v397_v41  ;;  %v399_v45 = vmul.f32 1.442695, %v333_v49  ;;  %v338_v41 = vsub.f32 %v2324_v7, %v2508_v58  ;;  %v407_v58 = vmul.f32 1.442695, %v337_v1 }
  0xc3   : > { %v405_v49 = vmul.f32 1.442695, %v336_v46  ;;  %v415_v1 = vmul.f32 1.442695, %v341_v59  ;;  %v413_v56 = vmul.f32 1.442695, %v340_v3  ;;  %v344_v55 = vsub.f32 %v2348_v13, %v2544_v62 }
  0xc4   : > { %v343_v6 = vsub.f32 %v2351_v14, %v2546_v60  ;;  %v342_v57 = vsub.f32 %v2333_v9, %v2524_v63  ;;  %v345_v63 = vsub.f32 %v2345_v12, %v2542_v61 }
  0xc5   : > { %321 = vmax.xlane.f32.xlu2 %v2549_v48  ;;  %319 = vmax.xlane.f32.xlu1 %v2552_v44  ;;  %v421_v3 = vmul.f32 1.442695, %v344_v55 }
  0xc6   : > { %317 = vmax.xlane.f32.xlu0 %v2555_v43  ;;  %v403_v43 = vmul.f32 1.442695, %v335_v5  ;;  %v409_v5 = vmul.f32 1.442695, %v338_v41  ;;  %v419_v62 = vmul.f32 1.442695, %v343_v6 }
  0xc7   : > { %v2591_v39 = vpop.eup %1830 }
  0xc8   : > { %v2562_v50 = vpop.xlane.xlu2 %237  ;;  %v2564_v42 = vpop.xlane.xlu1 %235  ;;  %1834 = vpow2.f32 %v403_v43 }
  0xc9   : > { %v2566_v36 = vpop.xlane.xlu0 %233  ;;  %v2596_v4 = vpop.eup %1832  ;;  %1836 = vpow2.f32 %v401_v0  ;;  %v347_v60 = vsub.f32 %v2360_v16, %v2564_v42  ;;  %v348_v61 = vsub.f32 %v2357_v15, %v2562_v50 }
  0xca   : > { %1838 = vpow2.f32 %v399_v45  ;;  %v346_v9 = vsub.f32 %v2363_v17, %v2566_v36 }
  0xcb   : > { %1840 = vpow2.f32 %v409_v5  ;;  %v411_v5 = vmul.f32 1.442695, %v339_v51  ;;  %v427_v6 = vmul.f32 1.442695, %v347_v60 }
  0xcc   : > { %1842 = vpow2.f32 %v407_v58  ;;  %v425_v42 = vmul.f32 1.442695, %v346_v9 }
  0xcd   : > { %327 = vmax.xlane.f32.xlu2 %v2569_v40  ;;  %325 = vmax.xlane.f32.xlu1 %v2572_v33  ;;  %v2594_v33 = vld [vmem:[%s2290_s24 + $0x1f8] sm:$0xff]  ;;  %1844 = vpow2.f32 %v405_v49 }
  0xce   : > { %323 = vmax.xlane.f32.xlu0 %v2575_v2  ;;  %v2613_v47 = vpop.eup %1834  ;;  %1846 = vpow2.f32 %v415_v1  ;;  %v417_v1 = vmul.f32 1.442695, %v342_v57 }
  0xcf   : > { %v2615_v0 = vpop.eup %1836  ;;  %1848 = vpow2.f32 %v413_v56 }
  0xd0   : > { %v2585_v53 = vpop.xlane.xlu2 %243  ;;  %v2587_v54 = vpop.xlane.xlu1 %241  ;;  %1850 = vpow2.f32 %v411_v5 }
  0xd1   : > { %v2589_v44 = vpop.xlane.xlu0 %239  ;;  %v2617_v8 = vpop.eup %1838  ;;  %1852 = vpow2.f32 %v421_v3  ;;  %v423_v3 = vmul.f32 1.442695, %v345_v63  ;;  %v350_v36 = vsub.f32 %v2372_v19, %v2587_v54  ;;  %v351_v50 = vsub.f32 %v2369_v18, %v2585_v53 }
  0xd2   : > { %v2634_v46 = vpop.eup %1840  ;;  %1854 = vpow2.f32 %v419_v62  ;;  %v349_v12 = vsub.f32 %v2375_v20, %v2589_v44 }
  0xd3   : > { %v2636_v58 = vpop.eup %1842  ;;  %1856 = vpow2.f32 %v417_v1  ;;  %v433_v9 = vmul.f32 1.442695, %v350_v36 }
  0xd4   : > { %v2638_v11 = vpop.eup %1844  ;;  %1858 = vpow2.f32 %v427_v6  ;;  %v431_v54 = vmul.f32 1.442695, %v349_v12  ;;  %v429_v6 = vmul.f32 1.442695, %v348_v61 }
  0xd5   : > { %523 = vadd.xlane.f32.xlu1 %v2591_v39  ;;  %525 = vadd.xlane.f32.xlu2 %v2596_v4  ;;  %v2655_v51 = vpop.eup %1846  ;;  %1860 = vpow2.f32 %v425_v42 }
  0xd6   : > { %329 = vmax.xlane.f32.xlu0 %v2594_v33  ;;  %v2657_v56 = vpop.eup %1848  ;;  %1862 = vpow2.f32 %v423_v3 }
  0xd7   : > { %v2659_v14 = vpop.eup %1850  ;;  %1864 = vpow2.f32 %v433_v9  ;;  %v435_v9 = vmul.f32 1.442695, %v351_v50 }
  0xd8   : > { %v2607_v52 = vpop.xlane.xlu2 %249  ;;  %v2609_v43 = vpop.xlane.xlu1 %247  ;;  %1866 = vpow2.f32 %v431_v54 }
  0xd9   : > { %v2611_v7 = vpop.xlane.xlu0 %245  ;;  %v2676_v57 = vpop.eup %1852  ;;  %v353_v44 = vsub.f32 %v2384_v22, %v2609_v43  ;;  %1868 = vpow2.f32 %v429_v6  ;;  %v354_v53 = vsub.f32 %v2381_v21, %v2607_v52 }
  0xda   : > { %v2678_v62 = vpop.eup %1854  ;;  %v352_v15 = vsub.f32 %v2387_v23, %v2611_v7 }
  0xdb   : > { %v2680_v17 = vpop.eup %1856  ;;  %v439_v12 = vmul.f32 1.442695, %v353_v44 }
  0xdc   : > { %v2697_v63 = vpop.eup %1858  ;;  %v437_v43 = vmul.f32 1.442695, %v352_v15 }
  0xdd   : > { %529 = vadd.xlane.f32.xlu1 %v2615_v0  ;;  %531 = vadd.xlane.f32.xlu2 %v2613_v47  ;;  %v2699_v42 = vpop.eup %1860  ;;  %1870 = vpow2.f32 %v439_v12  ;;  %v441_v12 = vmul.f32 1.442695, %v354_v53 }
  0xde   : > { %527 = vadd.xlane.f32.xlu0 %v2617_v8  ;;  %v2701_v20 = vpop.eup %1862  ;;  %1872 = vpow2.f32 %v437_v43 }
  0xdf   : > { %v2718_v61 = vpop.eup %1864  ;;  %1874 = vpow2.f32 %v435_v9 }
  0xe0   : > { %v2628_v45 = vpop.xlane.xlu2 %255  ;;  %v2630_v41 = vpop.xlane.xlu1 %253 }
  0xe1   : > { %v2632_v10 = vpop.xlane.xlu0 %251  ;;  %v2720_v54 = vpop.eup %1866  ;;  %v356_v7 = vsub.f32 %v2396_v25, %v2630_v41  ;;  %v357_v52 = vsub.f32 %v2393_v24, %v2628_v45 }
  0xe2   : > { %v2722_v23 = vpop.eup %1868  ;;  %v355_v18 = vsub.f32 %v2399_v26, %v2632_v10 }
  0xe3   : > { %v445_v15 = vmul.f32 1.442695, %v356_v7  ;;  %v2739_v50 = vpop.eup %1870 }
  0xe4   : > { %v443_v41 = vmul.f32 1.442695, %v355_v18  ;;  %v2741_v43 = vpop.eup %1872 }
  0xe5   : > { %537 = vadd.xlane.f32.xlu2 %v2634_v46  ;;  %535 = vadd.xlane.f32.xlu1 %v2636_v58  ;;  %v2743_v26 = vpop.eup %1874  ;;  %1876 = vpow2.f32 %v445_v15  ;;  %v447_v15 = vmul.f32 1.442695, %v357_v52 }
  0xe6   : > { %533 = vadd.xlane.f32.xlu0 %v2638_v11  ;;  %1878 = vpow2.f32 %v443_v41 }
  0xe7   : > { %1880 = vpow2.f32 %v441_v12 }
  0xe8   : > { %v2649_v49 = vpop.xlane.xlu2 %261  ;;  %v2651_v59 = vpop.xlane.xlu1 %259 }
  0xe9   : > { %v2653_v13 = vpop.xlane.xlu0 %257  ;;  %v359_v10 = vsub.f32 %v2408_v28, %v2651_v59  ;;  %v360_v45 = vsub.f32 %v2405_v27, %v2649_v49 }
  0xea   : > { %v358_v21 = vsub.f32 %v2411_v29, %v2653_v13 }
  0xeb   : > { %v451_v18 = vmul.f32 1.442695, %v359_v10  ;;  %v2760_v53 = vpop.eup %1876 }
  0xec   : > { %v449_v59 = vmul.f32 1.442695, %v358_v21  ;;  %v2762_v41 = vpop.eup %1878 }
  0xed   : > { %543 = vadd.xlane.f32.xlu2 %v2655_v51  ;;  %541 = vadd.xlane.f32.xlu1 %v2657_v56  ;;  %4150 = vst [vmem:[#allocation31_spill] sm:$0xff] %v2762_v41  ;;  %v2764_v29 = vpop.eup %1880  ;;  %1882 = vpow2.f32 %v451_v18  ;;  %v453_v18 = vmul.f32 1.442695, %v360_v45 }
  0xee   : > { %539 = vadd.xlane.f32.xlu0 %v2659_v14  ;;  %4151 = vst [vmem:[#allocation32_spill] sm:$0xff] %v2764_v29  ;;  %1884 = vpow2.f32 %v449_v59 }
  0xef   : > { %1886 = vpow2.f32 %v447_v15 }
  0xf0   : > { %v2670_v5 = vpop.xlane.xlu2 %267  ;;  %v2672_v55 = vpop.xlane.xlu1 %265 }
  0xf1   : > { %v2674_v16 = vpop.xlane.xlu0 %263  ;;  %v362_v13 = vsub.f32 %v2420_v31, %v2672_v55  ;;  %v363_v49 = vsub.f32 %v2417_v30, %v2670_v5  ;;  %v4158_v5 = vld [vmem:[#allocation8_spill] sm:$0xff] }
  0xf2   : > { %v361_v24 = vsub.f32 %v2423_v32, %v2674_v16 }
  0xf3   : > { %v457_v21 = vmul.f32 1.442695, %v362_v13  ;;  %v2781_v52 = vpop.eup %1882 }
  0xf4   : > { %v455_v55 = vmul.f32 1.442695, %v361_v24  ;;  %4152 = vst [vmem:[#allocation33_spill] sm:$0xff] %v2781_v52  ;;  %v2783_v59 = vpop.eup %1884 }
  0xf5   : > { %549 = vadd.xlane.f32.xlu2 %v2676_v57  ;;  %547 = vadd.xlane.f32.xlu1 %v2678_v62  ;;  %4153 = vst [vmem:[#allocation34_spill] sm:$0xff] %v2783_v59  ;;  %v2785_v32 = vpop.eup %1886  ;;  %1888 = vpow2.f32 %v457_v21  ;;  %v459_v21 = vmul.f32 1.442695, %v363_v49 }
  0xf6   : > { %545 = vadd.xlane.f32.xlu0 %v2680_v17  ;;  %4154 = vst [vmem:[#allocation35_spill] sm:$0xff] %v2785_v32  ;;  %1890 = vpow2.f32 %v455_v55 }
  0xf7   : > { %1892 = vpow2.f32 %v453_v18 }
  0xf8   : > { %v2691_v1 = vpop.xlane.xlu2 %273  ;;  %v2693_v60 = vpop.xlane.xlu1 %271 }
  0xf9   : > { %v2695_v19 = vpop.xlane.xlu0 %269  ;;  %v365_v16 = vsub.f32 %v2432_v34, %v2693_v60  ;;  %v366_v18 = vsub.f32 %v4158_v5, %v2691_v1  ;;  %v4163_v1 = vld [vmem:[#allocation12_spill] sm:$0xff] }
  0xfa   : > { %v364_v27 = vsub.f32 %v2435_v35, %v2695_v19 }
  0xfb   : > { %v463_v24 = vmul.f32 1.442695, %v365_v16  ;;  %v2802_v45 = vpop.eup %1888 }
  0xfc   : > { %v461_v60 = vmul.f32 1.442695, %v364_v27  ;;  %4155 = vst [vmem:[#allocation36_spill] sm:$0xff] %v2802_v45  ;;  %v2804_v55 = vpop.eup %1890 }
  0xfd   : > { %555 = vadd.xlane.f32.xlu2 %v2697_v63  ;;  %553 = vadd.xlane.f32.xlu1 %v2699_v42  ;;  %4156 = vst [vmem:[#allocation37_spill] sm:$0xff] %v2804_v55  ;;  %v2806_v35 = vpop.eup %1892  ;;  %1894 = vpow2.f32 %v463_v24 }
  0xfe   : > { %551 = vadd.xlane.f32.xlu0 %v2701_v20  ;;  %4157 = vst [vmem:[#allocation38_spill] sm:$0xff] %v2806_v35  ;;  %1896 = vpow2.f32 %v461_v60  ;;  %v465_v60 = vmul.f32 1.442695, %v366_v18 }
  0xff   : > { %1898 = vpow2.f32 %v459_v21 }
 0x100   : > { %v2712_v3 = vpop.xlane.xlu2 %279  ;;  %v2714_v36 = vpop.xlane.xlu1 %277 }
 0x101   : > { %v2716_v22 = vpop.xlane.xlu0 %275  ;;  %v368_v19 = vsub.f32 %v2444_v37, %v2714_v36 }
 0x102   : > { %v367_v30 = vsub.f32 %v2447_v38, %v2716_v22  ;;  %v4162_v22 = vld [vmem:[#allocation11_spill] sm:$0xff] }
 0x103   : > { %v469_v49 = vmul.f32 1.442695, %v368_v19  ;;  %v2823_v24 = vpop.eup %1894 }
 0x104   : > { %v467_v36 = vmul.f32 1.442695, %v367_v30  ;;  %4159 = vst [vmem:[#allocation8_spill] sm:$0xff] %v2823_v24  ;;  %v4164_v30 = vld [vmem:[#allocation9_spill] sm:$0xff] }
 0x105   : > { %561 = vadd.xlane.f32.xlu2 %v2718_v61  ;;  %559 = vadd.xlane.f32.xlu1 %v2720_v54  ;;  %1900 = vpow2.f32 %v469_v49  ;;  %v369_v5 = vsub.f32 %v4164_v30, %v2712_v3  ;;  %v4169_v3 = vld [vmem:[#allocation14_spill] sm:$0xff] }
 0x106   : > { %557 = vadd.xlane.f32.xlu0 %v2722_v23  ;;  %1902 = vpow2.f32 %v467_v36 }
 0x107   : > { %1904 = vpow2.f32 %v465_v60 }
 0x108   : > { %v2733_v6 = vpop.xlane.xlu2 %285  ;;  %v2735_v44 = vpop.xlane.xlu1 %283 }
 0x109   : > { %v2737_v25 = vpop.xlane.xlu0 %281  ;;  %v371_v21 = vsub.f32 %v4162_v22, %v2735_v44  ;;  %v4165_v22 = vld [vmem:[#allocation10_spill] sm:$0xff] }
 0x10a   : > { %v370_v19 = vsub.f32 %v4163_v1, %v2737_v25  ;;  %v471_v25 = vmul.f32 1.442695, %v369_v5  ;;  %v4167_v1 = vld [vmem:[#allocation13_spill] sm:$0xff] }
 0x10c   : > { %v473_v36 = vmul.f32 1.442695, %v370_v19  ;;  %v4172_v19 = vld [vmem:[#allocation16_spill] sm:$0xff] }
 0x10d   : > { %567 = vadd.xlane.f32.xlu2 %v2739_v50  ;;  %565 = vadd.xlane.f32.xlu1 %v2741_v43 }
 0x10e   : > { %563 = vadd.xlane.f32.xlu0 %v2743_v26 }
 0x110   : > { %v2754_v9 = vpop.xlane.xlu2 %291  ;;  %v2756_v7 = vpop.xlane.xlu1 %289 }
 0x111   : > { %v2758_v28 = vpop.xlane.xlu0 %287  ;;  %v375_v60 = vsub.f32 %v4167_v1, %v2754_v9  ;;  %v374_v30 = vsub.f32 %v4169_v3, %v2756_v7  ;;  %v4173_v7 = vld [vmem:[#allocation17_spill] sm:$0xff]  ;;  %v4174_v1 = vld [vmem:[#allocation18_spill] sm:$0xff] }
 0x113   : > { %v483_v5 = vmul.f32 1.442695, %v375_v60  ;;  %v4176_v60 = vld [vmem:[#allocation20_spill] sm:$0xff] }
 0x115   : > { %573 = vadd.xlane.f32.xlu2 %v2760_v53  ;;  %571 = vadd.xlane.f32.xlu1 %v2762_v41 }
 0x116   : > { %569 = vadd.xlane.f32.xlu0 %v2764_v29 }
 0x118   : > { %v2775_v12 = vpop.xlane.xlu2 %297  ;;  %v2777_v10 = vpop.xlane.xlu1 %295 }
 0x119   : > { %v2779_v31 = vpop.xlane.xlu0 %293  ;;  %v378_v9 = vsub.f32 %v4172_v19, %v2775_v12 }
 0x11d   : > { %579 = vadd.xlane.f32.xlu2 %v2781_v52  ;;  %577 = vadd.xlane.f32.xlu1 %v2783_v59 }
 0x11e   : > { %575 = vadd.xlane.f32.xlu0 %v2785_v32 }
 0x120   : > { %v2796_v15 = vpop.xlane.xlu2 %303  ;;  %v2798_v13 = vpop.xlane.xlu1 %301 }
 0x121   : > { %v2800_v34 = vpop.xlane.xlu0 %299  ;;  %v380_v19 = vsub.f32 %v4176_v60, %v2798_v13  ;;  %v4182_v13 = vld [vmem:[#allocation23_spill] sm:$0xff] }
 0x125   : > { %585 = vadd.xlane.f32.xlu2 %v2802_v45  ;;  %583 = vadd.xlane.f32.xlu1 %v2804_v55  ;;  %v2825_v55 = vpop.eup %1896 }
 0x126   : > { %581 = vadd.xlane.f32.xlu0 %v2806_v35  ;;  %4160 = vst [vmem:[#allocation39_spill] sm:$0xff] %v2825_v55  ;;  %v2827_v38 = vpop.eup %1898  ;;  %v475_v35 = vmul.f32 1.442695, %v371_v21  ;;  %v4171_v21 = vld [vmem:[#allocation15_spill] sm:$0xff] }
 0x127   : > { %4161 = vst [vmem:[#allocation40_spill] sm:$0xff] %v2827_v38  ;;  %v373_v32 = vsub.f32 %v4171_v21, %v2758_v28  ;;  %v376_v28 = vsub.f32 %v4174_v1, %v2779_v31  ;;  %v4178_v31 = vld [vmem:[#allocation21_spill] sm:$0xff] }
 0x128   : > { %v2817_v16 = vpop.xlane.xlu2 %309  ;;  %v2819_v27 = vpop.xlane.xlu1 %307  ;;  %1906 = vpow2.f32 %v475_v35  ;;  %v481_v35 = vmul.f32 1.442695, %v374_v30 }
 0x129   : > { %v2821_v37 = vpop.xlane.xlu0 %305  ;;  %1908 = vpow2.f32 %v473_v36  ;;  %v4175_v36 = vld [vmem:[#allocation19_spill] sm:$0xff] }
 0x12a   : > { %1910 = vpow2.f32 %v471_v25  ;;  %v489_v25 = vmul.f32 1.442695, %v378_v9  ;;  %v383_v9 = vsub.f32 %v4182_v13, %v2819_v27 }
 0x12d   : > { %591 = vadd.xlane.f32.xlu2 %v2823_v24  ;;  %589 = vadd.xlane.f32.xlu1 %v2825_v55  ;;  %v372_v55 = vsub.f32 %v4165_v22, %v2733_v6  ;;  %v2846_v24 = vpop.eup %1900  ;;  %v377_v22 = vsub.f32 %v4173_v7, %v2777_v10  ;;  %v379_v7 = vsub.f32 %v4178_v31, %v2800_v34  ;;  %v493_v34 = vmul.f32 1.442695, %v380_v19 }
 0x12e   : > { %587 = vadd.xlane.f32.xlu0 %v2827_v38  ;;  %4166 = vst [vmem:[#allocation11_spill] sm:$0xff] %v2846_v24  ;;  %v2850_v38 = vpop.eup %1902 }
 0x12f   : > { %4168 = vst [vmem:[#allocation12_spill] sm:$0xff] %v2850_v38  ;;  %v2854_v45 = vpop.eup %1904  ;;  %v477_v6 = vmul.f32 1.442695, %v372_v55  ;;  %v479_v55 = vmul.f32 1.442695, %v373_v32 }
 0x130   : > { %v2838_v18 = vpop.xlane.xlu2 %315  ;;  %v2840_v49 = vpop.xlane.xlu1 %313  ;;  %4170 = vst [vmem:[#allocation9_spill] sm:$0xff] %v2854_v45  ;;  %v487_v30 = vmul.f32 1.442695, %v377_v22  ;;  %v485_v32 = vmul.f32 1.442695, %v376_v28 }
 0x131   : > { %v2842_v44 = vpop.xlane.xlu0 %311  ;;  %1912 = vpow2.f32 %v477_v6  ;;  %v2877_v10 = vpop.eup %1906 }
 0x132   : > { %4177 = vst [vmem:[#allocation10_spill] sm:$0xff] %v2877_v10  ;;  %1914 = vpow2.f32 %v483_v5  ;;  %v2881_v1 = vpop.eup %1908  ;;  %v4183_v5 = vld [vmem:[#allocation24_spill] sm:$0xff] }
 0x133   : > { %4179 = vst [vmem:[#allocation13_spill] sm:$0xff] %v2881_v1  ;;  %1916 = vpow2.f32 %v481_v35  ;;  %v382_v22 = vsub.f32 %v4183_v5, %v2821_v37  ;;  %v4184_v35 = vld [vmem:[#allocation25_spill] sm:$0xff]  ;;  %v499_v37 = vmul.f32 1.442695, %v383_v9 }
 0x134   : > { %1918 = vpow2.f32 %v479_v55  ;;  %v387_v28 = vsub.f32 %v4184_v35, %v2838_v18  ;;  %v4186_v55 = vld [vmem:[#allocation26_spill] sm:$0xff] }
 0x135   : > { %597 = vadd.xlane.f32.xlu2 %v2846_v24  ;;  %595 = vadd.xlane.f32.xlu1 %v2850_v38  ;;  %v381_v38 = vsub.f32 %v4175_v36, %v2796_v15  ;;  %v4180_v15 = vld [vmem:[#allocation22_spill] sm:$0xff]  ;;  %1920 = vpow2.f32 %v489_v25  ;;  %v386_v60 = vsub.f32 %v4186_v55, %v2840_v49 }
 0x136   : > { %593 = vadd.xlane.f32.xlu0 %v2854_v45  ;;  %v384_v36 = vsub.f32 %v4180_v15, %v2817_v16  ;;  %v2885_v45 = vpop.eup %1910  ;;  %1922 = vpow2.f32 %v487_v30  ;;  %v491_v16 = vmul.f32 1.442695, %v379_v7  ;;  %v497_v30 = vmul.f32 1.442695, %v382_v22  ;;  %v4197_v55 = vld [vmem:[#allocation30_spill] sm:$0xff] }
 0x137   : > { %4181 = vst [vmem:[#allocation14_spill] sm:$0xff] %v2885_v45  ;;  %v495_v6 = vmul.f32 1.442695, %v381_v38  ;;  %v2896_v38 = vpop.eup %1912  ;;  %1924 = vpow2.f32 %v485_v32  ;;  %v507_v18 = vmul.f32 1.442695, %v387_v28  ;;  %v4190_v32 = vld [vmem:[#allocation27_spill] sm:$0xff] }
 0x138   : > { %v2867_v3 = vpop.xlane.xlu2 %321  ;;  %v2869_v21 = vpop.xlane.xlu1 %319  ;;  %4185 = vst [vmem:[#allocation15_spill] sm:$0xff] %v2896_v38  ;;  %v501_v27 = vmul.f32 1.442695, %v384_v36  ;;  %v385_v36 = vsub.f32 %v4190_v32, %v2842_v44  ;;  %v505_v49 = vmul.f32 1.442695, %v386_v60  ;;  %v4195_v44 = vld [vmem:[#allocation29_spill] sm:$0xff] }
 0x139   : > { %v2873_v12 = vpop.xlane.xlu0 %317  ;;  %v2900_v19 = vpop.eup %1914  ;;  %1926 = vpow2.f32 %v495_v6  ;;  %v390_v6 = vsub.f32 %v2549_v48, %v2867_v3 }
 0x13a   : > { %4187 = vst [vmem:[#allocation16_spill] sm:$0xff] %v2900_v19  ;;  %v2902_v13 = vpop.eup %1916  ;;  %1928 = vpow2.f32 %v493_v34  ;;  %v4193_v34 = vld [vmem:[#allocation28_spill] sm:$0xff]  ;;  %v388_v35 = vsub.f32 %v4195_v44, %v2873_v12  ;;  %v503_v48 = vmul.f32 1.442695, %v385_v36 }
 0x13b   : > { %4188 = vst [vmem:[#allocation17_spill] sm:$0xff] %v2902_v13  ;;  %v2904_v7 = vpop.eup %1918  ;;  %1930 = vpow2.f32 %v491_v16  ;;  %v389_v22 = vsub.f32 %v4193_v34, %v2869_v21  ;;  %v513_v21 = vmul.f32 1.442695, %v390_v6 }
 0x13c   : > { %4189 = vst [vmem:[#allocation18_spill] sm:$0xff] %v2904_v7  ;;  %v2908_v5 = vpop.eup %1920  ;;  %1932 = vpow2.f32 %v501_v27  ;;  %v509_v36 = vmul.f32 1.442695, %v388_v35 }
 0x13d   : > { %603 = vadd.xlane.f32.xlu2 %v2877_v10  ;;  %601 = vadd.xlane.f32.xlu1 %v2881_v1  ;;  %4191 = vst [vmem:[#allocation19_spill] sm:$0xff] %v2908_v5  ;;  %v2912_v9 = vpop.eup %1922  ;;  %1934 = vpow2.f32 %v499_v37  ;;  %v511_v12 = vmul.f32 1.442695, %v389_v22 }
 0x13e   : > { %599 = vadd.xlane.f32.xlu0 %v2885_v45  ;;  %4192 = vst [vmem:[#allocation20_spill] sm:$0xff] %v2912_v9  ;;  %v2918_v16 = vpop.eup %1924  ;;  %1936 = vpow2.f32 %v497_v30 }
 0x13f   : > { %4194 = vst [vmem:[#allocation21_spill] sm:$0xff] %v2918_v16  ;;  %v2923_v28 = vpop.eup %1926  ;;  %1938 = vpow2.f32 %v507_v18 }
 0x140   : > { %v328_v31 = vpop.xlane.xlu2 %327  ;;  %v326_v25 = vpop.xlane.xlu1 %325  ;;  %1940 = vpow2.f32 %v505_v49 }
 0x141   : > { %v324_v15 = vpop.xlane.xlu0 %323  ;;  %v393_v3 = vsub.f32 %v2569_v40, %v328_v31  ;;  %v2926_v27 = vpop.eup %1928  ;;  %v392_v60 = vsub.f32 %v4197_v55, %v326_v25 }
 0x142   : > { %4196 = vst [vmem:[#allocation22_spill] sm:$0xff] %v2926_v27  ;;  %v2933_v32 = vpop.eup %1930  ;;  %v391_v25 = vsub.f32 %v2575_v2, %v324_v15 }
 0x143   : > { %4198 = vst [vmem:[#allocation23_spill] sm:$0xff] %v2933_v32  ;;  %v2936_v18 = vpop.eup %1932  ;;  %v519_v31 = vmul.f32 1.442695, %v393_v3  ;;  %v517_v6 = vmul.f32 1.442695, %v392_v60 }
 0x144   : > { %v2939_v40 = vpop.eup %1934 }
 0x145   : > { %609 = vadd.xlane.f32.xlu2 %v2902_v13  ;;  %607 = vadd.xlane.f32.xlu1 %v2904_v7  ;;  %v2942_v49 = vpop.eup %1936 }
 0x146   : > { %605 = vadd.xlane.f32.xlu0 %v2896_v38  ;;  %v2944_v44 = vpop.eup %1938 }
 0x147   : > { %v2948_v22 = vpop.eup %1940 }
 0x148   : > { %v2929_v37 = vpop.xlane.xlu1 %523  ;;  %v2931_v30 = vpop.xlane.xlu2 %525 }
 0x149   : > { %1942 = vrcp.f32 %v2929_v37  ;;  %v330_v34 = vpop.xlane.xlu0 %329  ;;  %vm656_vm0 = vweird.f32 %v2929_v37  ;;  %vm670_vm2 = vweird.f32 %v2931_v30 }
 0x14a   : > { %1944 = vrcp.f32 %v2931_v30  ;;  %v394_v2 = vsub.f32 %v2594_v33, %v330_v34 }
 0x14b   : > { %1946 = vpow2.f32 %v503_v48  ;;  %v515_v48 = vmul.f32 1.442695, %v391_v25  ;;  %v674_v25 = vand.u32 2147483647, %v2931_v30 }
 0x14c   : > { %1948 = vpow2.f32 %v513_v21  ;;  %v521_v38 = vmul.f32 1.442695, %v394_v2 }
 0x14d   : > { %1950 = vpow2.f32 %v511_v12  ;;  %615 = vadd.xlane.f32.xlu2 %v2912_v9  ;;  %613 = vadd.xlane.f32.xlu1 %v2918_v16  ;;  %v660_v12 = vand.u32 2147483647, %v2929_v37  ;;  %vm2987_vm5 = vcmp.eq.f32.partialorder %v674_v25, 8.507059e+37 }
 0x14e   : > { %1952 = vpow2.f32 %v509_v36  ;;  %611 = vadd.xlane.f32.xlu0 %v2900_v19  ;;  %v662_v36 = vand.u32 2147483648, %v2929_v37 }
 0x14f   : > { %v1943_v35 = vpop.eup %1942  ;;  %1954 = vpow2.f32 %v519_v31  ;;  %vm2979_vm3 = vcmp.eq.f32.partialorder %v660_v12, 8.507059e+37 }
 0x150   : > { %v1945_v15 = vpop.eup %1944  ;;  %1956 = vpow2.f32 %v517_v6  ;;  %v652_v3 = vmul.f32 %v1943_v35, %v2929_v37  ;;  %v2953_v21 = vpop.xlane.xlu1 %529  ;;  %v676_v6 = vand.u32 2147483648, %v2931_v30  ;;  %vm657_vm1 = vweird.f32 %v1943_v35 }
 0x151   : > { %v2955_v55 = vpop.xlane.xlu2 %531  ;;  %v2957_v60 = vpop.eup %1946  ;;  %v666_v19 = vmul.f32 %v1945_v15, %v2931_v30  ;;  %1958 = vrcp.f32 %v2953_v21  ;;  %v663_v1 = vor.u32 1.1754944e-38, %v662_v36  ;;  %vm671_vm4 = vweird.f32 %v1945_v15  ;;  %vm658_vm6 = vmor %vm656_vm0, %vm657_vm1 }
 0x152   : > { %v2963_v31 = vpop.xlane.xlu0 %527  ;;  %v2965_v33 = vpop.eup %1948  ;;  %v653_v34 = vsub.f32 1.0, %v652_v3  ;;  %1960 = vrcp.f32 %v2955_v55  ;;  %v677_v10 = vor.u32 1.1754944e-38, %v676_v6  ;;  %v702_v12 = vand.u32 2147483647, %v2953_v21  ;;  %vm672_vm8 = vmor %vm670_vm2, %vm671_vm4 }
 0x153   : > { %v2970_v16 = vpop.eup %1950  ;;  %1962 = vpow2.f32 %v515_v48  ;;  %v667_v9 = vsub.f32 1.0, %v666_v19  ;;  %vm698_vm7 = vweird.f32 %v2953_v21  ;;  %vm712_vm9 = vweird.f32 %v2955_v55 }
 0x154   : > { %v2973_v7 = vpop.eup %1952  ;;  %v654_v13 = vmul.f32 %v1943_v35, %v653_v34  ;;  %1964 = vrcp.f32 %v2963_v31  ;;  %v718_v30 = vand.u32 2147483648, %v2955_v55  ;;  %vm3015_vm10 = vcmp.eq.f32.partialorder %v702_v12, 8.507059e+37 }
 0x155   : > { %v2977_v3 = vpop.eup %1954  ;;  %v668_v48 = vmul.f32 %v1945_v15, %v667_v9  ;;  %621 = vadd.xlane.f32.xlu2 %v2926_v27  ;;  %619 = vadd.xlane.f32.xlu1 %v2933_v32  ;;  %1966 = vpow2.f32 %v521_v38  ;;  %vm684_vm1 = vweird.f32 %v2963_v31 }
 0x156   : > { %v2985_v19 = vpop.eup %1956  ;;  %v655_v2 = vadd.f32 %v1943_v35, %v654_v13  ;;  %617 = vadd.xlane.f32.xlu0 %v2908_v5  ;;  %v704_v13 = vand.u32 2147483648, %v2953_v21  ;;  %v716_v5 = vand.u32 2147483647, %v2955_v55 }
 0x157   : > { %v1959_v24 = vpop.eup %1958  ;;  %v669_v9 = vadd.f32 %v1945_v15, %v668_v48 }
 0x158   : > { %v1961_v36 = vpop.eup %1960  ;;  %v659_v25 = vsel %vm658_vm6, %v1943_v35, %v655_v2  ;;  %v694_v6 = vmul.f32 %v1959_v24, %v2953_v21  ;;  %v3019_v41 = vpop.xlane.xlu1 %535  ;;  %vm699_vm11 = vweird.f32 %v1959_v24  ;;  %vm3039_vm13 = vcmp.eq.f32.partialorder %v716_v5, 8.507059e+37 }
 0x159   : > { %v3004_v37 = vpop.xlane.xlu2 %537  ;;  %v3006_v38 = vpop.eup %1962  ;;  %v664_v48 = vsel %vm2979_vm3, %v663_v1, %v659_v25  ;;  %v673_v32 = vsel %vm672_vm8, %v1945_v15, %v669_v9  ;;  %v708_v35 = vmul.f32 %v1961_v36, %v2955_v55  ;;  %v688_v9 = vand.u32 2147483647, %v2963_v31  ;;  %vm700_vm14 = vmor %vm698_vm7, %vm699_vm11 }
 0x15a   : > { %v1965_v2 = vpop.eup %1964  ;;  %v1547_v27 = vmul.f32 %v2591_v39, %v664_v48  ;;  %v678_v59 = vsel %vm2987_vm5, %v677_v10, %v673_v32  ;;  %v695_v52 = vsub.f32 1.0, %v694_v6  ;;  %v690_v10 = vand.u32 2147483648, %v2963_v31  ;;  %v3035_v34 = vpop.xlane.xlu0 %533 }
 0x15b   : > { %v1548_v45 = vmul.f32 %v2596_v4, %v678_v59  ;;  %v709_v1 = vsub.f32 1.0, %v708_v35  ;;  %v680_v15 = vmul.f32 %v1965_v2, %v2963_v31  ;;  %1968 = vrcp.f32 %v3004_v37  ;;  %v3031_v32 = vpop.eup %1966 }
 0x15c   : > { %1611 = vst [vmem:[%s3026_s17] sm:$0xff] %v1547_v27  ;;  %v696_v39 = vmul.f32 %v1959_v24, %v695_v52  ;;  %vm713_vm12 = vweird.f32 %v1961_v36  ;;  %1970 = vrcp.f32 %v3019_v41  ;;  %v705_v27 = vor.u32 1.1754944e-38, %v704_v13 }
 0x15d   : > { %1612 = vst [vmem:[%s3026_s17 + $0x8] sm:$0xff] %v1548_v45  ;;  %v710_v4 = vmul.f32 %v1961_v36, %v709_v1  ;;  %v681_v59 = vsub.f32 1.0, %v680_v15  ;;  %627 = vadd.xlane.f32.xlu2 %v2939_v40  ;;  %625 = vadd.xlane.f32.xlu1 %v2942_v49  ;;  %v719_v25 = vor.u32 1.1754944e-38, %v718_v30  ;;  %vm685_vm15 = vweird.f32 %v1965_v2  ;;  %vm714_vm0 = vmor %vm712_vm9, %vm713_vm12 }
 0x15e   : > { %v697_v52 = vadd.f32 %v1959_v24, %v696_v39  ;;  %623 = vadd.xlane.f32.xlu0 %v2923_v28  ;;  %v758_v35 = vand.u32 2147483647, %v3004_v37  ;;  %vm3052_vm2 = vcmp.eq.f32.partialorder %v688_v9, 8.507059e+37  ;;  %1972 = vrcp.f32 %v3035_v34  ;;  %vm686_vm3 = vmor %vm684_vm1, %vm685_vm15 }
 0x15f   : > { %v711_v6 = vadd.f32 %v1961_v36, %v710_v4  ;;  %v682_v48 = vmul.f32 %v1965_v2, %v681_v59  ;;  %v691_v1 = vor.u32 1.1754944e-38, %v690_v10  ;;  %vm754_vm4 = vweird.f32 %v3004_v37 }
 0x160   : > { %v701_v45 = vsel %vm700_vm14, %v1959_v24, %v697_v52  ;;  %v760_v31 = vand.u32 2147483648, %v3004_v37  ;;  %vm3068_vm5 = vcmp.eq.f32.partialorder %v758_v35, 8.507059e+37  ;;  %vm740_vm6 = vweird.f32 %v3019_v41 }
 0x161   : > { %v706_v21 = vsel %vm3015_vm10, %v705_v27, %v701_v45  ;;  %v715_v13 = vsel %vm714_vm0, %v1961_v36, %v711_v6  ;;  %v683_v30 = vadd.f32 %v1965_v2, %v682_v48  ;;  %v1969_v24 = vpop.eup %1968  ;;  %v3064_v9 = vpop.xlane.xlu2 %543  ;;  %v744_v52 = vand.u32 2147483647, %v3019_v41 }
 0x162   : > { %v1550_v15 = vmul.f32 %v2615_v0, %v706_v21  ;;  %v720_v55 = vsel %vm3039_vm13, %v719_v25, %v715_v13  ;;  %v1971_v29 = vpop.eup %1970  ;;  %v750_v10 = vmul.f32 %v1969_v24, %v3004_v37  ;;  %v3078_v27 = vpop.xlane.xlu1 %541  ;;  %v746_v12 = vand.u32 2147483648, %v3019_v41 }
 0x163   : > { %v1551_v39 = vmul.f32 %v2613_v47, %v720_v55  ;;  %v687_v36 = vsel %vm686_vm3, %v1965_v2, %v683_v30  ;;  %v736_v59 = vmul.f32 %v1971_v29, %v3019_v41  ;;  %1974 = vrcp.f32 %v3064_v9  ;;  %v3092_v21 = vpop.xlane.xlu0 %539 }
 0x164   : > { %1614 = vst [vmem:[%s3026_s17 + $0x18] sm:$0xff] %v1550_v15  ;;  %v692_v0 = vsel %vm3052_vm2, %v691_v1, %v687_v36  ;;  %v751_v2 = vsub.f32 1.0, %v750_v10  ;;  %v1973_v25 = vpop.eup %1972  ;;  %v761_v6 = vor.u32 1.1754944e-38, %v760_v31  ;;  %v730_v35 = vand.u32 2147483647, %v3035_v34 }
 0x165   : > { %1615 = vst [vmem:[%s3026_s17 + $0x20] sm:$0xff] %v1551_v39  ;;  %v1549_v47 = vmul.f32 %v2617_v8, %v692_v0  ;;  %633 = vadd.xlane.f32.xlu2 %v2948_v22  ;;  %631 = vadd.xlane.f32.xlu1 %v2957_v60  ;;  %v737_v48 = vsub.f32 1.0, %v736_v59  ;;  %v732_v45 = vand.u32 2147483648, %v3035_v34  ;;  %vm755_vm7 = vweird.f32 %v1969_v24 }
 0x166   : > { %629 = vadd.xlane.f32.xlu0 %v2936_v18  ;;  %v752_v8 = vmul.f32 %v1969_v24, %v751_v2  ;;  %v722_v5 = vmul.f32 %v1973_v25, %v3035_v34  ;;  %1976 = vrcp.f32 %v3078_v27  ;;  %vm741_vm8 = vweird.f32 %v1971_v29  ;;  %vm756_vm11 = vmor %vm754_vm4, %vm755_vm7 }
 0x167   : > { %1613 = vst [vmem:[%s3026_s17 + $0x10] sm:$0xff] %v1549_v47  ;;  %v738_v13 = vmul.f32 %v1971_v29, %v737_v48  ;;  %vm3094_vm9 = vcmp.eq.f32.partialorder %v744_v52, 8.507059e+37  ;;  %vm726_vm10 = vweird.f32 %v3035_v34  ;;  %v747_v15 = vor.u32 1.1754944e-38, %v746_v12  ;;  %vm742_vm13 = vmor %vm740_vm6, %vm741_vm8 }
 0x168   : > { %v753_v1 = vadd.f32 %v1969_v24, %v752_v8  ;;  %v723_v55 = vsub.f32 1.0, %v722_v5  ;;  %v800_v31 = vand.u32 2147483647, %v3064_v9  ;;  %vm3102_vm12 = vcmp.eq.f32.partialorder %v730_v35, 8.507059e+37 }
 0x169   : > { %v739_v39 = vadd.f32 %v1971_v29, %v738_v13  ;;  %v802_v10 = vand.u32 2147483648, %v3064_v9  ;;  %1978 = vrcp.f32 %v3092_v21  ;;  %v1975_v0 = vpop.eup %1974  ;;  %vm727_vm14 = vweird.f32 %v1973_v25  ;;  %v3114_v48 = vpop.xlane.xlu2 %549 }
 0x16a   : > { %v757_v59 = vsel %vm756_vm11, %v1969_v24, %v753_v1  ;;  %v724_v52 = vmul.f32 %v1973_v25, %v723_v55  ;;  %v733_v47 = vor.u32 1.1754944e-38, %v732_v45  ;;  %v792_v12 = vmul.f32 %v1975_v0, %v3064_v9  ;;  %vm728_vm1 = vmor %vm726_vm10, %vm727_vm14  ;;  %v3138_v55 = vpop.xlane.xlu1 %547 }
 0x16b   : > { %v762_v37 = vsel %vm3068_vm5, %v761_v6, %v757_v59  ;;  %v743_v2 = vsel %vm742_vm13, %v1971_v29, %v739_v39  ;;  %vm796_vm15 = vweird.f32 %v3064_v9  ;;  %vm3119_vm0 = vcmp.eq.f32.partialorder %v800_v31, 8.507059e+37  ;;  %v3145_v36 = vpop.xlane.xlu0 %545 }
 0x16c   : > { %v1977_v35 = vpop.eup %1976  ;;  %v1554_v24 = vmul.f32 %v2634_v46, %v762_v37  ;;  %v748_v41 = vsel %vm3094_vm9, %v747_v15, %v743_v2  ;;  %v725_v8 = vadd.f32 %v1973_v25, %v724_v52  ;;  %v793_v46 = vsub.f32 1.0, %v792_v12 }
 0x16d   : > { %639 = vadd.xlane.f32.xlu2 %v2970_v16  ;;  %637 = vadd.xlane.f32.xlu1 %v2973_v7  ;;  %v1553_v29 = vmul.f32 %v2636_v58, %v748_v41  ;;  %v803_v4 = vor.u32 1.1754944e-38, %v802_v10  ;;  %v778_v6 = vmul.f32 %v1977_v35, %v3078_v27  ;;  %v786_v13 = vand.u32 2147483647, %v3078_v27 }
 0x16e   : > { %635 = vadd.xlane.f32.xlu0 %v2944_v44  ;;  %1618 = vst [vmem:[%s3026_s17 + $0x38] sm:$0xff] %v1554_v24  ;;  %v729_v5 = vsel %vm728_vm1, %v1973_v25, %v725_v8  ;;  %v788_v30 = vand.u32 2147483648, %v3078_v27  ;;  %1980 = vrcp.f32 %v3114_v48  ;;  %v794_v34 = vmul.f32 %v1975_v0, %v793_v46 }
 0x16f   : > { %v1979_v1 = vpop.eup %1978  ;;  %1617 = vst [vmem:[%s3026_s17 + $0x30] sm:$0xff] %v1553_v29  ;;  %v734_v58 = vsel %vm3102_vm12, %v733_v47, %v729_v5  ;;  %vm797_vm2 = vweird.f32 %v1975_v0  ;;  %v779_v15 = vsub.f32 1.0, %v778_v6  ;;  %vm782_vm3 = vweird.f32 %v3078_v27 }
 0x170   : > { %v1552_v31 = vmul.f32 %v2638_v11, %v734_v58  ;;  %v764_v25 = vmul.f32 %v1979_v1, %v3092_v21  ;;  %vm768_vm4 = vweird.f32 %v3092_v21  ;;  %v795_v39 = vadd.f32 %v1975_v0, %v794_v34  ;;  %vm798_vm6 = vmor %vm796_vm15, %vm797_vm2 }
 0x171   : > { %v780_v10 = vmul.f32 %v1977_v35, %v779_v15  ;;  %vm783_vm5 = vweird.f32 %v1977_v35  ;;  %v772_v59 = vand.u32 2147483647, %v3092_v21  ;;  %vm3150_vm7 = vcmp.eq.f32.partialorder %v786_v13, 8.507059e+37  ;;  %v3171_v27 = vpop.xlane.xlu2 %555 }
 0x172   : > { %1616 = vst [vmem:[%s3026_s17 + $0x28] sm:$0xff] %v1552_v31  ;;  %v789_v11 = vor.u32 1.1754944e-38, %v788_v30  ;;  %v765_v47 = vsub.f32 1.0, %v764_v25  ;;  %1982 = vrcp.f32 %v3138_v55  ;;  %v799_v37 = vsel %vm798_vm6, %v1975_v0, %v795_v39  ;;  %vm784_vm8 = vmor %vm782_vm3, %vm783_vm5  ;;  %v3194_v39 = vpop.xlane.xlu1 %553 }
 0x173   : > { %v781_v2 = vadd.f32 %v1977_v35, %v780_v10  ;;  %v774_v12 = vand.u32 2147483648, %v3092_v21  ;;  %v842_v24 = vand.u32 2147483647, %v3114_v48  ;;  %v804_v8 = vsel %vm3119_vm0, %v803_v4, %v799_v37 }
 0x174   : > { %v1981_v41 = vpop.eup %1980  ;;  %v766_v9 = vmul.f32 %v1979_v1, %v765_v47  ;;  %vm769_vm9 = vweird.f32 %v1979_v1  ;;  %1984 = vrcp.f32 %v3145_v36  ;;  %v1557_v0 = vmul.f32 %v2655_v51, %v804_v8 }
 0x175   : > { %645 = vadd.xlane.f32.xlu2 %v2985_v19  ;;  %643 = vadd.xlane.f32.xlu1 %v3006_v38  ;;  %v785_v29 = vsel %vm784_vm8, %v1977_v35, %v781_v2  ;;  %vm3166_vm10 = vcmp.eq.f32.partialorder %v772_v59, 8.507059e+37  ;;  %v834_v45 = vmul.f32 %v1981_v41, %v3114_v48  ;;  %v844_v5 = vand.u32 2147483648, %v3114_v48  ;;  %vm770_vm11 = vmor %vm768_vm4, %vm769_vm9 }
 0x176   : > { %641 = vadd.xlane.f32.xlu0 %v2965_v33  ;;  %v790_v4 = vsel %vm3150_vm7, %v789_v11, %v785_v29  ;;  %v767_v6 = vadd.f32 %v1979_v1, %v766_v9  ;;  %v828_v51 = vand.u32 2147483647, %v3138_v55  ;;  %1621 = vst [vmem:[%s3026_s17 + $0x50] sm:$0xff] %v1557_v0  ;;  %v775_v13 = vor.u32 1.1754944e-38, %v774_v12  ;;  %v3203_v12 = vpop.xlane.xlu0 %551 }
 0x177   : > { %v1556_v35 = vmul.f32 %v2657_v56, %v790_v4  ;;  %v835_v30 = vsub.f32 1.0, %v834_v45  ;;  %v830_v58 = vand.u32 2147483648, %v3138_v55  ;;  %vm838_vm12 = vweird.f32 %v3114_v48 }
 0x178   : > { %v1983_v34 = vpop.eup %1982  ;;  %v771_v15 = vsel %vm770_vm11, %v1979_v1, %v767_v6  ;;  %vm3185_vm13 = vcmp.eq.f32.partialorder %v842_v24, 8.507059e+37  ;;  %1986 = vrcp.f32 %v3171_v27  ;;  %vm839_vm14 = vweird.f32 %v1981_v41 }
 0x179   : > { %1620 = vst [vmem:[%s3026_s17 + $0x48] sm:$0xff] %v1556_v35  ;;  %v776_v56 = vsel %vm3166_vm10, %v775_v13, %v771_v15  ;;  %v836_v21 = vmul.f32 %v1981_v41, %v835_v30  ;;  %v820_v25 = vmul.f32 %v1983_v34, %v3138_v55  ;;  %v845_v59 = vor.u32 1.1754944e-38, %v844_v5  ;;  %vm840_vm1 = vmor %vm838_vm12, %vm839_vm14  ;;  %v3220_v5 = vpop.xlane.xlu2 %561 }
 0x17a   : > { %v1985_v1 = vpop.eup %1984  ;;  %v1555_v10 = vmul.f32 %v2659_v14, %v776_v56  ;;  %vm824_vm15 = vweird.f32 %v3138_v55  ;;  %vm3198_vm0 = vcmp.eq.f32.partialorder %v828_v51, 8.507059e+37  ;;  %v831_v37 = vor.u32 1.1754944e-38, %v830_v58 }
 0x17b   : > { %v837_v11 = vadd.f32 %v1981_v41, %v836_v21  ;;  %v821_v47 = vsub.f32 1.0, %v820_v25  ;;  %v806_v2 = vmul.f32 %v1985_v1, %v3145_v36  ;;  %v814_v14 = vand.u32 2147483647, %v3145_v36 }
 0x17c   : > { %1619 = vst [vmem:[%s3026_s17 + $0x40] sm:$0xff] %v1555_v10  ;;  %v816_v24 = vand.u32 2147483648, %v3145_v36  ;;  %v884_v8 = vand.u32 2147483647, %v3171_v27  ;;  %1988 = vrcp.f32 %v3194_v39  ;;  %vm825_vm2 = vweird.f32 %v1983_v34 }
 0x17d   : > { %649 = vadd.xlane.f32.xlu1 %v3031_v32  ;;  %v841_v9 = vsel %vm840_vm1, %v1981_v41, %v837_v11  ;;  %v822_v0 = vmul.f32 %v1983_v34, %v821_v47  ;;  %v807_v29 = vsub.f32 1.0, %v806_v2  ;;  %vm810_vm3 = vweird.f32 %v3145_v36  ;;  %vm826_vm5 = vmor %vm824_vm15, %vm825_vm2 }
 0x17e   : > { %647 = vadd.xlane.f32.xlu0 %v2977_v3  ;;  %v1987_v46 = vpop.eup %1986  ;;  %v846_v48 = vsel %vm3185_vm13, %v845_v59, %v841_v9  ;;  %vm811_vm4 = vweird.f32 %v1985_v1  ;;  %1990 = vrcp.f32 %v3203_v12  ;;  %vm3224_vm6 = vcmp.eq.f32.partialorder %v814_v14, 8.507059e+37  ;;  %v3244_v59 = vpop.xlane.xlu1 %559 }
 0x17f   : > { %v1560_v45 = vmul.f32 %v2676_v57, %v846_v48  ;;  %v823_v4 = vadd.f32 %v1983_v34, %v822_v0  ;;  %v808_v6 = vmul.f32 %v1985_v1, %v807_v29  ;;  %v876_v41 = vmul.f32 %v1987_v46, %v3171_v27  ;;  %vm812_vm9 = vmor %vm810_vm3, %vm811_vm4  ;;  %v3264_v29 = vpop.xlane.xlu0 %557 }
 0x180   : > { %v817_v35 = vor.u32 1.1754944e-38, %v816_v24  ;;  %vm880_vm7 = vweird.f32 %v3171_v27  ;;  %v886_v13 = vand.u32 2147483648, %v3171_v27  ;;  %vm3231_vm8 = vcmp.eq.f32.partialorder %v884_v8, 8.507059e+37 }
 0x181   : > { %1624 = vst [vmem:[%s3026_s17 + $0x68] sm:$0xff] %v1560_v45  ;;  %v827_v57 = vsel %vm826_vm5, %v1983_v34, %v823_v4  ;;  %v809_v30 = vadd.f32 %v1985_v1, %v808_v6  ;;  %v877_v58 = vsub.f32 1.0, %v876_v41  ;;  %vm881_vm10 = vweird.f32 %v1987_v46  ;;  %v3271_v51 = vpop.xlane.xlu2 %567 }
 0x182   : > { %v1989_v31 = vpop.eup %1988  ;;  %v832_v55 = vsel %vm3198_vm0, %v831_v37, %v827_v57  ;;  %v870_v56 = vand.u32 2147483647, %v3194_v39  ;;  %1992 = vrcp.f32 %v3220_v5  ;;  %v887_v36 = vor.u32 1.1754944e-38, %v886_v13  ;;  %vm882_vm12 = vmor %vm880_vm7, %vm881_vm10 }
 0x183   : > { %v1559_v34 = vmul.f32 %v2678_v62, %v832_v55  ;;  %v813_v21 = vsel %vm812_vm9, %v1985_v1, %v809_v30  ;;  %v878_v25 = vmul.f32 %v1987_v46, %v877_v58  ;;  %v862_v10 = vmul.f32 %v1989_v31, %v3194_v39 }
 0x184   : > { %v1991_v52 = vpop.eup %1990  ;;  %v818_v11 = vsel %vm3224_vm6, %v817_v35, %v813_v21  ;;  %vm866_vm11 = vweird.f32 %v3194_v39  ;;  %v872_v47 = vand.u32 2147483648, %v3194_v39  ;;  %vm3256_vm13 = vcmp.eq.f32.partialorder %v870_v56, 8.507059e+37 }
 0x185   : > { %1623 = vst [vmem:[%s3026_s17 + $0x60] sm:$0xff] %v1559_v34  ;;  %v1558_v37 = vmul.f32 %v2680_v17, %v818_v11  ;;  %v879_v62 = vadd.f32 %v1987_v46, %v878_v25  ;;  %v863_v1 = vsub.f32 1.0, %v862_v10  ;;  %v848_v2 = vmul.f32 %v1991_v52, %v3203_v12 }
 0x186   : > { %v856_v24 = vand.u32 2147483647, %v3203_v12  ;;  %v858_v8 = vand.u32 2147483648, %v3203_v12  ;;  %1994 = vrcp.f32 %v3244_v59  ;;  %vm867_vm14 = vweird.f32 %v1989_v31  ;;  %v3292_v10 = vpop.xlane.xlu1 %565 }
 0x187   : > { %1622 = vst [vmem:[%s3026_s17 + $0x58] sm:$0xff] %v1558_v37  ;;  %v883_v17 = vsel %vm882_vm12, %v1987_v46, %v879_v62  ;;  %v864_v9 = vmul.f32 %v1989_v31, %v863_v1  ;;  %v849_v0 = vsub.f32 1.0, %v848_v2  ;;  %v873_v45 = vor.u32 1.1754944e-38, %v872_v47  ;;  %vm868_vm1 = vmor %vm866_vm11, %vm867_vm14 }
 0x188   : > { %v1993_v27 = vpop.eup %1992  ;;  %v888_v48 = vsel %vm3231_vm8, %v887_v36, %v883_v17  ;;  %vm852_vm15 = vweird.f32 %v3203_v12  ;;  %vm853_vm0 = vweird.f32 %v1991_v52  ;;  %vm3275_vm2 = vcmp.eq.f32.partialorder %v856_v24, 8.507059e+37  ;;  %v3314_v24 = vpop.xlane.xlu0 %563 }
 0x189   : > { %v1563_v4 = vmul.f32 %v2697_v63, %v888_v48  ;;  %v865_v6 = vadd.f32 %v1989_v31, %v864_v9  ;;  %v850_v41 = vmul.f32 %v1991_v52, %v849_v0  ;;  %v918_v46 = vmul.f32 %v1993_v27, %v3220_v5  ;;  %vm854_vm3 = vmor %vm852_vm15, %vm853_vm0 }
 0x18a   : > { %v859_v13 = vor.u32 1.1754944e-38, %v858_v8  ;;  %v926_v57 = vand.u32 2147483647, %v3220_v5  ;;  %1996 = vrcp.f32 %v3264_v29  ;;  %v928_v15 = vand.u32 2147483648, %v3220_v5 }
 0x18b   : > { %1627 = vst [vmem:[%s3026_s17 + $0x80] sm:$0xff] %v1563_v4  ;;  %v869_v63 = vsel %vm868_vm1, %v1989_v31, %v865_v6  ;;  %v851_v30 = vadd.f32 %v1991_v52, %v850_v41  ;;  %v919_v58 = vsub.f32 1.0, %v918_v46  ;;  %vm923_vm4 = vweird.f32 %v1993_v27 }
 0x18c   : > { %v1995_v55 = vpop.eup %1994  ;;  %v874_v39 = vsel %vm3256_vm13, %v873_v45, %v869_v63  ;;  %v912_v56 = vand.u32 2147483647, %v3244_v59  ;;  %1998 = vrcp.f32 %v3271_v51  ;;  %vm922_vm5 = vweird.f32 %v3220_v5 }
 0x18d   : > { %v1562_v31 = vmul.f32 %v2699_v42, %v874_v39  ;;  %v855_v34 = vsel %vm854_vm3, %v1991_v52, %v851_v30  ;;  %v920_v21 = vmul.f32 %v1993_v27, %v919_v58  ;;  %v904_v25 = vmul.f32 %v1995_v55, %v3244_v59  ;;  %vm924_vm8 = vmor %vm922_vm5, %vm923_vm4 }
 0x18e   : > { %v860_v11 = vsel %vm3275_vm2, %v859_v13, %v855_v34  ;;  %vm3297_vm6 = vcmp.eq.f32.partialorder %v926_v57, 8.507059e+37  ;;  %v914_v36 = vand.u32 2147483648, %v3244_v59  ;;  %vm908_vm7 = vweird.f32 %v3244_v59  ;;  %v3332_v57 = vpop.xlane.xlu2 %573 }
 0x18f   : > { %1626 = vst [vmem:[%s3026_s17 + $0x78] sm:$0xff] %v1562_v31  ;;  %v1561_v42 = vmul.f32 %v2701_v20, %v860_v11  ;;  %v921_v52 = vadd.f32 %v1993_v27, %v920_v21  ;;  %v905_v47 = vsub.f32 1.0, %v904_v25  ;;  %v929_v62 = vor.u32 1.1754944e-38, %v928_v15 }
 0x190   : > { %v1997_v37 = vpop.eup %1996  ;;  %vm3306_vm9 = vcmp.eq.f32.partialorder %v912_v56, 8.507059e+37  ;;  %v898_v5 = vand.u32 2147483647, %v3264_v29  ;;  %2000 = vrcp.f32 %v3292_v10  ;;  %vm909_vm10 = vweird.f32 %v1995_v55  ;;  %v3339_v56 = vpop.xlane.xlu1 %571 }
 0x191   : > { %1625 = vst [vmem:[%s3026_s17 + $0x70] sm:$0xff] %v1561_v42  ;;  %v925_v2 = vsel %vm924_vm8, %v1993_v27, %v921_v52  ;;  %v906_v14 = vmul.f32 %v1995_v55, %v905_v47  ;;  %v890_v20 = vmul.f32 %v1997_v37, %v3264_v29  ;;  %v915_v9 = vor.u32 1.1754944e-38, %v914_v36  ;;  %vm910_vm12 = vmor %vm908_vm7, %vm909_vm10  ;;  %v3360_v1 = vpop.xlane.xlu0 %569 }
 0x192   : > { %v1999_v8 = vpop.eup %1998  ;;  %v930_v17 = vsel %vm3297_vm6, %v929_v62, %v925_v2  ;;  %vm894_vm11 = vweird.f32 %v3264_v29  ;;  %v900_v0 = vand.u32 2147483648, %v3264_v29  ;;  %vm3324_vm13 = vcmp.eq.f32.partialorder %v898_v5, 8.507059e+37 }
 0x193   : > { %v1566_v48 = vmul.f32 %v2718_v61, %v930_v17  ;;  %v907_v45 = vadd.f32 %v1995_v55, %v906_v14  ;;  %v891_v27 = vsub.f32 1.0, %v890_v20  ;;  %v960_v4 = vmul.f32 %v1999_v8, %v3271_v51 }
 0x194   : > { %v968_v41 = vand.u32 2147483647, %v3271_v51  ;;  %v970_v46 = vand.u32 2147483648, %v3271_v51  ;;  %2002 = vrcp.f32 %v3314_v24  ;;  %vm895_vm14 = vweird.f32 %v1997_v37 }
 0x195   : > { %1630 = vst [vmem:[%s3026_s17 + $0x98] sm:$0xff] %v1566_v48  ;;  %v911_v35 = vsel %vm910_vm12, %v1995_v55, %v907_v45  ;;  %v892_v61 = vmul.f32 %v1997_v37, %v891_v27  ;;  %v961_v13 = vsub.f32 1.0, %v960_v4  ;;  %v901_v30 = vor.u32 1.1754944e-38, %v900_v0  ;;  %vm896_vm1 = vmor %vm894_vm11, %vm895_vm14 }
 0x196   : > { %v2001_v59 = vpop.eup %2000  ;;  %v916_v63 = vsel %vm3306_vm9, %v915_v9, %v911_v35  ;;  %vm964_vm15 = vweird.f32 %v3271_v51  ;;  %vm965_vm0 = vweird.f32 %v1999_v8  ;;  %vm3343_vm2 = vcmp.eq.f32.partialorder %v968_v41, 8.507059e+37  ;;  %v3382_v45 = vpop.xlane.xlu2 %579 }
 0x197   : > { %v1565_v58 = vmul.f32 %v2720_v54, %v916_v63  ;;  %v893_v15 = vadd.f32 %v1997_v37, %v892_v61  ;;  %v962_v39 = vmul.f32 %v1999_v8, %v961_v13  ;;  %v946_v55 = vmul.f32 %v2001_v59, %v3292_v10  ;;  %vm966_vm3 = vmor %vm964_vm15, %vm965_vm0 }
 0x198   : > { %v971_v34 = vor.u32 1.1754944e-38, %v970_v46  ;;  %v954_v21 = vand.u32 2147483647, %v3292_v10  ;;  %2004 = vrcp.f32 %v3332_v57  ;;  %v956_v12 = vand.u32 2147483648, %v3292_v10 }
 0x199   : > { %1629 = vst [vmem:[%s3026_s17 + $0x90] sm:$0xff] %v1565_v58  ;;  %v897_v54 = vsel %vm896_vm1, %v1997_v37, %v893_v15  ;;  %v963_v25 = vadd.f32 %v1999_v8, %v962_v39  ;;  %v947_v11 = vsub.f32 1.0, %v946_v55  ;;  %vm951_vm4 = vweird.f32 %v2001_v59  ;;  %v3400_v39 = vpop.xlane.xlu1 %577 }
 0x19a   : > { %v2003_v36 = vpop.eup %2002  ;;  %v902_v29 = vsel %vm3324_vm13, %v901_v30, %v897_v54  ;;  %v940_v42 = vand.u32 2147483647, %v3314_v24  ;;  %2006 = vrcp.f32 %v3339_v56  ;;  %vm950_vm5 = vweird.f32 %v3292_v10 }
 0x19b   : > { %v1564_v52 = vmul.f32 %v2722_v23, %v902_v29  ;;  %v967_v47 = vsel %vm966_vm3, %v1999_v8, %v963_v25  ;;  %v948_v37 = vmul.f32 %v2001_v59, %v947_v11  ;;  %v932_v62 = vmul.f32 %v2003_v36, %v3314_v24  ;;  %vm952_vm8 = vmor %vm950_vm5, %vm951_vm4  ;;  %v3407_v11 = vpop.xlane.xlu0 %575 }
 0x19c   : > { %v972_v5 = vsel %vm3343_vm2, %v971_v34, %v967_v47  ;;  %vm3365_vm6 = vcmp.eq.f32.partialorder %v954_v21, 8.507059e+37  ;;  %v942_v2 = vand.u32 2147483648, %v3314_v24  ;;  %vm936_vm7 = vweird.f32 %v3314_v24 }
 0x19d   : > { %1628 = vst [vmem:[%s3026_s17 + $0x88] sm:$0xff] %v1564_v52  ;;  %v1569_v23 = vmul.f32 %v2739_v50, %v972_v5  ;;  %v949_v14 = vadd.f32 %v2001_v59, %v948_v37  ;;  %v933_v20 = vsub.f32 1.0, %v932_v62  ;;  %v957_v17 = vor.u32 1.1754944e-38, %v956_v12 }
 0x19e   : > { %v2005_v8 = vpop.eup %2004  ;;  %vm3374_vm9 = vcmp.eq.f32.partialorder %v940_v42, 8.507059e+37  ;;  %v1010_v10 = vand.u32 2147483647, %v3332_v57  ;;  %2008 = vrcp.f32 %v3360_v1  ;;  %vm937_vm10 = vweird.f32 %v2003_v36 }
 0x19f   : > { %1633 = vst [vmem:[%s3026_s17 + $0xb0] sm:$0xff] %v1569_v23  ;;  %v953_v0 = vsel %vm952_vm8, %v2001_v59, %v949_v14  ;;  %v934_v48 = vmul.f32 %v2003_v36, %v933_v20  ;;  %v1002_v50 = vmul.f32 %v2005_v8, %v3332_v57  ;;  %v943_v6 = vor.u32 1.1754944e-38, %v942_v2  ;;  %vm938_vm12 = vmor %vm936_vm7, %vm937_vm10  ;;  %v3428_v14 = vpop.xlane.xlu2 %585  ;;  %v4254_v59 = vld [vmem:[#allocation32_spill] sm:$0xff] }
 0x1a0   : > { %v2007_v27 = vpop.eup %2006  ;;  %v958_v4 = vsel %vm3365_vm6, %v957_v17, %v953_v0  ;;  %vm1006_vm11 = vweird.f32 %v3332_v57  ;;  %v1012_v41 = vand.u32 2147483648, %v3332_v57  ;;  %vm3392_vm13 = vcmp.eq.f32.partialorder %v1010_v10, 8.507059e+37 }
 0x1a1   : > { %v1568_v46 = vmul.f32 %v2741_v43, %v958_v4  ;;  %v935_v35 = vadd.f32 %v2003_v36, %v934_v48  ;;  %v1003_v61 = vsub.f32 1.0, %v1002_v50  ;;  %v988_v13 = vmul.f32 %v2007_v27, %v3339_v56 }
 0x1a2   : > { %v996_v63 = vand.u32 2147483647, %v3339_v56  ;;  %v998_v30 = vand.u32 2147483648, %v3339_v56  ;;  %2010 = vrcp.f32 %v3382_v45  ;;  %vm1007_vm14 = vweird.f32 %v2005_v8 }
 0x1a3   : > { %1632 = vst [vmem:[%s3026_s17 + $0xa8] sm:$0xff] %v1568_v46  ;;  %v939_v58 = vsel %vm938_vm12, %v2003_v36, %v935_v35  ;;  %v1004_v43 = vmul.f32 %v2005_v8, %v1003_v61  ;;  %v989_v15 = vsub.f32 1.0, %v988_v13  ;;  %v1013_v31 = vor.u32 1.1754944e-38, %v1012_v41  ;;  %vm1008_vm1 = vmor %vm1006_vm11, %vm1007_vm14  ;;  %v3450_v41 = vpop.xlane.xlu1 %583 }
 0x1a4   : > { %v2009_v24 = vpop.eup %2008  ;;  %v944_v55 = vsel %vm3374_vm9, %v943_v6, %v939_v58  ;;  %vm992_vm15 = vweird.f32 %v3339_v56  ;;  %vm993_vm0 = vweird.f32 %v2007_v27  ;;  %vm3411_vm2 = vcmp.eq.f32.partialorder %v996_v63, 8.507059e+37 }
 0x1a5   : > { %v1567_v34 = vmul.f32 %v2743_v26, %v944_v55  ;;  %v1005_v21 = vadd.f32 %v2005_v8, %v1004_v43  ;;  %v990_v54 = vmul.f32 %v2007_v27, %v989_v15  ;;  %v974_v25 = vmul.f32 %v2009_v24, %v3360_v1  ;;  %vm994_vm3 = vmor %vm992_vm15, %vm993_vm0 }
 0x1a6   : > { %v999_v36 = vor.u32 1.1754944e-38, %v998_v30  ;;  %v982_v29 = vand.u32 2147483647, %v3360_v1  ;;  %2012 = vrcp.f32 %v3400_v39  ;;  %v984_v47 = vand.u32 2147483648, %v3360_v1 }
 0x1a7   : > { %1631 = vst [vmem:[%s3026_s17 + $0xa0] sm:$0xff] %v1567_v34  ;;  %v1009_v26 = vsel %vm1008_vm1, %v2005_v8, %v1005_v21  ;;  %v991_v42 = vadd.f32 %v2007_v27, %v990_v54  ;;  %v975_v52 = vsub.f32 1.0, %v974_v25  ;;  %vm979_vm4 = vweird.f32 %v2009_v24  ;;  %v3468_v54 = vpop.xlane.xlu0 %581 }
 0x1a8   : > { %v2011_v37 = vpop.eup %2010  ;;  %v1014_v57 = vsel %vm3392_vm13, %v1013_v31, %v1009_v26  ;;  %v1052_v62 = vand.u32 2147483647, %v3382_v45  ;;  %2014 = vrcp.f32 %v3407_v11  ;;  %vm978_vm5 = vweird.f32 %v3360_v1 }
 0x1a9   : > { %v1572_v5 = vmul.f32 %v2760_v53, %v1014_v57  ;;  %v995_v51 = vsel %vm994_vm3, %v2007_v27, %v991_v42  ;;  %v976_v2 = vmul.f32 %v2009_v24, %v975_v52  ;;  %v1044_v23 = vmul.f32 %v2011_v37, %v3382_v45  ;;  %v4251_v53 = vld [vmem:[#allocation31_spill] sm:$0xff]  ;;  %vm980_vm8 = vmor %vm978_vm5, %vm979_vm4 }
 0x1aa   : > { %v1000_v20 = vsel %vm3411_vm2, %v999_v36, %v995_v51  ;;  %vm3433_vm6 = vcmp.eq.f32.partialorder %v982_v29, 8.507059e+37  ;;  %v1054_v8 = vand.u32 2147483648, %v3382_v45  ;;  %vm1048_vm7 = vweird.f32 %v3382_v45  ;;  %v4257_v36 = vld [vmem:[#allocation33_spill] sm:$0xff] }
 0x1ab   : > { %1636 = vst [vmem:[%s3026_s17 + $0xc8] sm:$0xff] %v1572_v5  ;;  %v1571_v17 = vmul.f32 %v4251_v53, %v1000_v20  ;;  %v977_v9 = vadd.f32 %v2009_v24, %v976_v2  ;;  %v1045_v10 = vsub.f32 1.0, %v1044_v23  ;;  %v985_v48 = vor.u32 1.1754944e-38, %v984_v47  ;;  %v3475_v47 = vpop.xlane.xlu2 %591 }
 0x1ac   : > { %v2013_v0 = vpop.eup %2012  ;;  %vm3442_vm9 = vcmp.eq.f32.partialorder %v1052_v62, 8.507059e+37  ;;  %v1038_v1 = vand.u32 2147483647, %v3400_v39  ;;  %2016 = vrcp.f32 %v3428_v14  ;;  %vm1049_vm10 = vweird.f32 %v2011_v37 }
 0x1ad   : > { %1635 = vst [vmem:[%s3026_s17 + $0xc0] sm:$0xff] %v1571_v17  ;;  %v981_v27 = vsel %vm980_vm8, %v2009_v24, %v977_v9  ;;  %v1046_v4 = vmul.f32 %v2011_v37, %v1045_v10  ;;  %v1030_v6 = vmul.f32 %v2013_v0, %v3400_v39  ;;  %v1055_v61 = vor.u32 1.1754944e-38, %v1054_v8  ;;  %vm1050_vm12 = vmor %vm1048_vm7, %vm1049_vm10  ;;  %v4260_v8 = vld [vmem:[#allocation34_spill] sm:$0xff] }
 0x1ae   : > { %v2015_v46 = vpop.eup %2014  ;;  %v986_v35 = vsel %vm3433_vm6, %v985_v48, %v981_v27  ;;  %vm1034_vm11 = vweird.f32 %v3400_v39  ;;  %v1040_v13 = vand.u32 2147483648, %v3400_v39  ;;  %vm3460_vm13 = vcmp.eq.f32.partialorder %v1038_v1, 8.507059e+37  ;;  %v4263_v1 = vld [vmem:[#allocation35_spill] sm:$0xff] }
 0x1af   : > { %v1570_v63 = vmul.f32 %v4254_v59, %v986_v35  ;;  %v1047_v30 = vadd.f32 %v2011_v37, %v1046_v4  ;;  %v1031_v58 = vsub.f32 1.0, %v1030_v6  ;;  %v1016_v43 = vmul.f32 %v2015_v46, %v3407_v11 }
 0x1b0   : > { %v1024_v24 = vand.u32 2147483647, %v3407_v11  ;;  %v1026_v55 = vand.u32 2147483648, %v3407_v11  ;;  %2018 = vrcp.f32 %v3450_v41  ;;  %vm1035_vm14 = vweird.f32 %v2013_v0 }
 0x1b1   : > { %1634 = vst [vmem:[%s3026_s17 + $0xb8] sm:$0xff] %v1570_v63  ;;  %v1051_v31 = vsel %vm1050_vm12, %v2011_v37, %v1047_v30  ;;  %v1032_v34 = vmul.f32 %v2013_v0, %v1031_v58  ;;  %v1017_v21 = vsub.f32 1.0, %v1016_v43  ;;  %v1041_v12 = vor.u32 1.1754944e-38, %v1040_v13  ;;  %vm1036_vm1 = vmor %vm1034_vm11, %vm1035_vm14  ;;  %v3518_v30 = vpop.xlane.xlu0 %587 }
 0x1b2   : > { %v2017_v45 = vpop.eup %2016  ;;  %v1056_v25 = vsel %vm3442_vm9, %v1055_v61, %v1051_v31  ;;  %vm1020_vm15 = vweird.f32 %v3407_v11  ;;  %vm1021_vm0 = vweird.f32 %v2015_v46  ;;  %vm3479_vm2 = vcmp.eq.f32.partialorder %v1024_v24, 8.507059e+37 }
 0x1b3   : > { %v1575_v29 = vmul.f32 %v4257_v36, %v1056_v25  ;;  %v1033_v26 = vadd.f32 %v2013_v0, %v1032_v34  ;;  %v1018_v42 = vmul.f32 %v2015_v46, %v1017_v21  ;;  %v1086_v52 = vmul.f32 %v2017_v45, %v3428_v14  ;;  %vm1022_vm3 = vmor %vm1020_vm15, %vm1021_vm0 }
 0x1b4   : > { %v1027_v57 = vor.u32 1.1754944e-38, %v1026_v55  ;;  %v1094_v62 = vand.u32 2147483647, %v3428_v14  ;;  %2020 = vrcp.f32 %v3468_v54  ;;  %v1096_v23 = vand.u32 2147483648, %v3428_v14  ;;  %v4266_v55 = vld [vmem:[#allocation36_spill] sm:$0xff] }
 0x1b5   : > { %1639 = vst [vmem:[%s3026_s17 + $0xe0] sm:$0xff] %v1575_v29  ;;  %v1037_v5 = vsel %vm1036_vm1, %v2013_v0, %v1033_v26  ;;  %v1019_v51 = vadd.f32 %v2015_v46, %v1018_v42  ;;  %v1087_v2 = vsub.f32 1.0, %v1086_v52  ;;  %vm1091_vm4 = vweird.f32 %v2017_v45  ;;  %v3496_v0 = vpop.xlane.xlu1 %589  ;;  %v3536_v52 = vpop.xlane.xlu2 %597 }
 0x1b6   : > { %v2019_v20 = vpop.eup %2018  ;;  %v1042_v39 = vsel %vm3460_vm13, %v1041_v12, %v1037_v5  ;;  %v1080_v56 = vand.u32 2147483647, %v3450_v41  ;;  %2022 = vrcp.f32 %v3475_v47  ;;  %vm1090_vm5 = vweird.f32 %v3428_v14 }
 0x1b7   : > { %v1574_v53 = vmul.f32 %v4260_v8, %v1042_v39  ;;  %v1023_v17 = vsel %vm1022_vm3, %v2015_v46, %v1019_v51  ;;  %v1088_v9 = vmul.f32 %v2017_v45, %v1087_v2  ;;  %v1072_v10 = vmul.f32 %v2019_v20, %v3450_v41  ;;  %vm1092_vm8 = vmor %vm1090_vm5, %vm1091_vm4 }
 0x1b8   : > { %v1028_v48 = vsel %vm3479_vm2, %v1027_v57, %v1023_v17  ;;  %vm3501_vm6 = vcmp.eq.f32.partialorder %v1094_v62, 8.507059e+37  ;;  %v1082_v50 = vand.u32 2147483648, %v3450_v41  ;;  %vm1076_vm7 = vweird.f32 %v3450_v41  ;;  %v4269_v62 = vld [vmem:[#allocation37_spill] sm:$0xff] }
 0x1b9   : > { %1638 = vst [vmem:[%s3026_s17 + $0xd8] sm:$0xff] %v1574_v53  ;;  %v1573_v27 = vmul.f32 %v4263_v1, %v1028_v48  ;;  %v1089_v4 = vadd.f32 %v2017_v45, %v1088_v9  ;;  %v1073_v6 = vsub.f32 1.0, %v1072_v10  ;;  %v1097_v35 = vor.u32 1.1754944e-38, %v1096_v23 }
 0x1ba   : > { %v2021_v46 = vpop.eup %2020  ;;  %vm3510_vm9 = vcmp.eq.f32.partialorder %v1080_v56, 8.507059e+37  ;;  %v1066_v14 = vand.u32 2147483647, %v3468_v54  ;;  %2024 = vrcp.f32 %v3496_v0  ;;  %vm1077_vm10 = vweird.f32 %v2019_v20 }
 0x1bb   : > { %1637 = vst [vmem:[%s3026_s17 + $0xd0] sm:$0xff] %v1573_v27  ;;  %v1093_v13 = vsel %vm1092_vm8, %v2017_v45, %v1089_v4  ;;  %v1074_v59 = vmul.f32 %v2019_v20, %v1073_v6  ;;  %v1058_v63 = vmul.f32 %v2021_v46, %v3468_v54  ;;  %v1083_v15 = vor.u32 1.1754944e-38, %v1082_v50  ;;  %vm1078_vm12 = vmor %vm1076_vm7, %vm1077_vm10  ;;  %v4272_v50 = vld [vmem:[#allocation38_spill] sm:$0xff] }
 0x1bc   : > { %v2023_v58 = vpop.eup %2022  ;;  %v1098_v43 = vsel %vm3501_vm6, %v1097_v35, %v1093_v13  ;;  %vm1062_vm11 = vweird.f32 %v3468_v54  ;;  %v1068_v24 = vand.u32 2147483648, %v3468_v54  ;;  %vm3528_vm13 = vcmp.eq.f32.partialorder %v1066_v14, 8.507059e+37  ;;  %v4275_v14 = vld [vmem:[#allocation8_spill] sm:$0xff] }
 0x1bd   : > { %v1578_v31 = vmul.f32 %v4266_v55, %v1098_v43  ;;  %v1075_v34 = vadd.f32 %v2019_v20, %v1074_v59  ;;  %v1059_v21 = vsub.f32 1.0, %v1058_v63  ;;  %v1128_v45 = vmul.f32 %v2023_v58, %v3475_v47 }
 0x1be   : > { %v1136_v12 = vand.u32 2147483647, %v3475_v47  ;;  %v1138_v36 = vand.u32 2147483648, %v3475_v47  ;;  %2026 = vrcp.f32 %v3518_v30  ;;  %vm1063_vm14 = vweird.f32 %v2021_v46 }
 0x1bf   : > { %1642 = vst [vmem:[%s3026_s17 + $0xf8] sm:$0xff] %v1578_v31  ;;  %v1079_v29 = vsel %vm1078_vm12, %v2019_v20, %v1075_v34  ;;  %v1060_v26 = vmul.f32 %v2021_v46, %v1059_v21  ;;  %v1129_v42 = vsub.f32 1.0, %v1128_v45  ;;  %v1069_v57 = vor.u32 1.1754944e-38, %v1068_v24  ;;  %v3543_v20 = vpop.xlane.xlu1 %595  ;;  %vm1064_vm1 = vmor %vm1062_vm11, %vm1063_vm14  ;;  %v3586_v34 = vpop.xlane.xlu2 %603 }
 0x1c0   : > { %v2025_v41 = vpop.eup %2024  ;;  %v1084_v37 = vsel %vm3510_vm9, %v1083_v15, %v1079_v29  ;;  %vm1132_vm15 = vweird.f32 %v3475_v47  ;;  %vm1133_vm0 = vweird.f32 %v2023_v58  ;;  %vm3547_vm2 = vcmp.eq.f32.partialorder %v1136_v12, 8.507059e+37 }
 0x1c1   : > { %v1577_v5 = vmul.f32 %v4269_v62, %v1084_v37  ;;  %v1061_v51 = vadd.f32 %v2021_v46, %v1060_v26  ;;  %v1130_v2 = vmul.f32 %v2023_v58, %v1129_v42  ;;  %v1114_v23 = vmul.f32 %v2025_v41, %v3496_v0  ;;  %vm1134_vm3 = vmor %vm1132_vm15, %vm1133_vm0 }
 0x1c2   : > { %v1139_v56 = vor.u32 1.1754944e-38, %v1138_v36  ;;  %v1122_v8 = vand.u32 2147483647, %v3496_v0  ;;  %2028 = vrcp.f32 %v3536_v52  ;;  %v1124_v10 = vand.u32 2147483648, %v3496_v0  ;;  %v4278_v36 = vld [vmem:[#allocation39_spill] sm:$0xff] }
 0x1c3   : > { %1641 = vst [vmem:[%s3026_s17 + $0xf0] sm:$0xff] %v1577_v5  ;;  %v1065_v53 = vsel %vm1064_vm1, %v2021_v46, %v1061_v51  ;;  %v1131_v17 = vadd.f32 %v2023_v58, %v1130_v2  ;;  %v1115_v9 = vsub.f32 1.0, %v1114_v23  ;;  %vm1119_vm4 = vweird.f32 %v2025_v41  ;;  %v3564_v46 = vpop.xlane.xlu0 %593 }
 0x1c4   : > { %v2027_v48 = vpop.eup %2026  ;;  %v1070_v54 = vsel %vm3528_vm13, %v1069_v57, %v1065_v53  ;;  %v1108_v11 = vand.u32 2147483647, %v3518_v30  ;;  %2030 = vrcp.f32 %v3543_v20  ;;  %vm1118_vm5 = vweird.f32 %v3496_v0 }
 0x1c5   : > { %v1576_v1 = vmul.f32 %v4272_v50, %v1070_v54  ;;  %v1135_v27 = vsel %vm1134_vm3, %v2023_v58, %v1131_v17  ;;  %v1116_v4 = vmul.f32 %v2025_v41, %v1115_v9  ;;  %v1100_v6 = vmul.f32 %v2027_v48, %v3518_v30  ;;  %vm1120_vm8 = vmor %vm1118_vm5, %vm1119_vm4 }
 0x1c6   : > { %v1140_v35 = vsel %vm3547_vm2, %v1139_v56, %v1135_v27  ;;  %vm3569_vm6 = vcmp.eq.f32.partialorder %v1122_v8, 8.507059e+37  ;;  %v1110_v61 = vand.u32 2147483648, %v3518_v30  ;;  %vm1104_vm7 = vweird.f32 %v3518_v30  ;;  %v4281_v8 = vld [vmem:[#allocation40_spill] sm:$0xff] }
 0x1c7   : > { %1640 = vst [vmem:[%s3026_s17 + $0xe8] sm:$0xff] %v1576_v1  ;;  %v1581_v13 = vmul.f32 %v4275_v14, %v1140_v35  ;;  %v1117_v59 = vadd.f32 %v2025_v41, %v1116_v4  ;;  %v1101_v63 = vsub.f32 1.0, %v1100_v6  ;;  %v1125_v43 = vor.u32 1.1754944e-38, %v1124_v10  ;;  %v3604_v23 = vpop.xlane.xlu1 %601 }
 0x1c8   : > { %v2029_v58 = vpop.eup %2028  ;;  %vm3578_vm9 = vcmp.eq.f32.partialorder %v1108_v11, 8.507059e+37  ;;  %v1178_v0 = vand.u32 2147483647, %v3536_v52  ;;  %2032 = vrcp.f32 %v3564_v46  ;;  %vm1105_vm10 = vweird.f32 %v2027_v48 }
 0x1c9   : > { %1645 = vst [vmem:[%s3026_s17 + $0x110] sm:$0xff] %v1581_v13  ;;  %v1121_v24 = vsel %vm1120_vm8, %v2025_v41, %v1117_v59  ;;  %v1102_v55 = vmul.f32 %v2027_v48, %v1101_v63  ;;  %v1170_v31 = vmul.f32 %v2029_v58, %v3536_v52  ;;  %v1111_v25 = vor.u32 1.1754944e-38, %v1110_v61  ;;  %vm1106_vm12 = vmor %vm1104_vm7, %vm1105_vm10  ;;  %v4284_v61 = vld [vmem:[#allocation11_spill] sm:$0xff] }
 0x1ca   : > { %v2031_v21 = vpop.eup %2030  ;;  %v1126_v45 = vsel %vm3569_vm6, %v1125_v43, %v1121_v24  ;;  %vm1174_vm11 = vweird.f32 %v3536_v52  ;;  %v1180_v12 = vand.u32 2147483648, %v3536_v52  ;;  %vm3596_vm13 = vcmp.eq.f32.partialorder %v1178_v0, 8.507059e+37  ;;  %v4287_v0 = vld [vmem:[#allocation12_spill] sm:$0xff] }
 0x1cb   : > { %v1580_v29 = vmul.f32 %v4278_v36, %v1126_v45  ;;  %v1103_v26 = vadd.f32 %v2027_v48, %v1102_v55  ;;  %v1171_v42 = vsub.f32 1.0, %v1170_v31  ;;  %v1156_v41 = vmul.f32 %v2031_v21, %v3543_v20 }
 0x1cc   : > { %v1164_v57 = vand.u32 2147483647, %v3543_v20  ;;  %v1166_v62 = vand.u32 2147483648, %v3543_v20  ;;  %2034 = vrcp.f32 %v3586_v34  ;;  %vm1175_vm14 = vweird.f32 %v2029_v58 }
 0x1cd   : > { %1644 = vst [vmem:[%s3026_s17 + $0x108] sm:$0xff] %v1580_v29  ;;  %v1107_v5 = vsel %vm1106_vm12, %v2027_v48, %v1103_v26  ;;  %v1172_v51 = vmul.f32 %v2029_v58, %v1171_v42  ;;  %v1157_v2 = vsub.f32 1.0, %v1156_v41  ;;  %v1181_v56 = vor.u32 1.1754944e-38, %v1180_v12  ;;  %v3611_v48 = vpop.xlane.xlu0 %599  ;;  %vm1176_vm1 = vmor %vm1174_vm11, %vm1175_vm14 }
 0x1ce   : > { %v2033_v30 = vpop.eup %2032  ;;  %v1112_v39 = vsel %vm3578_vm9, %v1111_v25, %v1107_v5  ;;  %vm1160_vm15 = vweird.f32 %v3543_v20  ;;  %vm1161_vm0 = vweird.f32 %v2031_v21  ;;  %vm3615_vm2 = vcmp.eq.f32.partialorder %v1164_v57, 8.507059e+37 }
 0x1cf   : > { %v1579_v53 = vmul.f32 %v4281_v8, %v1112_v39  ;;  %v1173_v17 = vadd.f32 %v2029_v58, %v1172_v51  ;;  %v1158_v9 = vmul.f32 %v2031_v21, %v1157_v2  ;;  %v1142_v10 = vmul.f32 %v2033_v30, %v3564_v46  ;;  %vm1162_vm3 = vmor %vm1160_vm15, %vm1161_vm0  ;;  %v3654_v26 = vpop.xlane.xlu1 %607 }
 0x1d0   : > { %v1167_v11 = vor.u32 1.1754944e-38, %v1166_v62  ;;  %v1150_v50 = vand.u32 2147483647, %v3564_v46  ;;  %2036 = vrcp.f32 %v3604_v23  ;;  %v1152_v6 = vand.u32 2147483648, %v3564_v46  ;;  %v4290_v62 = vld [vmem:[#allocation9_spill] sm:$0xff] }
 0x1d1   : > { %1643 = vst [vmem:[%s3026_s17 + $0x100] sm:$0xff] %v1579_v53  ;;  %v1177_v1 = vsel %vm1176_vm1, %v2029_v58, %v1173_v17  ;;  %v1159_v27 = vadd.f32 %v2031_v21, %v1158_v9  ;;  %v1143_v4 = vsub.f32 1.0, %v1142_v10  ;;  %vm1147_vm4 = vweird.f32 %v2033_v30  ;;  %v3632_v58 = vpop.xlane.xlu2 %609 }
 0x1d2   : > { %v2035_v35 = vpop.eup %2034  ;;  %v1182_v52 = vsel %vm3596_vm13, %v1181_v56, %v1177_v1  ;;  %v1220_v47 = vand.u32 2147483647, %v3586_v34  ;;  %2038 = vrcp.f32 %v3611_v48  ;;  %vm1146_vm5 = vweird.f32 %v3564_v46 }
 0x1d3   : > { %v1584_v14 = vmul.f32 %v4284_v61, %v1182_v52  ;;  %v1163_v13 = vsel %vm1162_vm3, %v2031_v21, %v1159_v27  ;;  %v1144_v59 = vmul.f32 %v2033_v30, %v1143_v4  ;;  %v1212_v63 = vmul.f32 %v2035_v35, %v3586_v34  ;;  %vm1148_vm8 = vmor %vm1146_vm5, %vm1147_vm4 }
 0x1d4   : > { %v1168_v43 = vsel %vm3615_vm2, %v1167_v11, %v1163_v13  ;;  %vm3637_vm6 = vcmp.eq.f32.partialorder %v1150_v50, 8.507059e+37  ;;  %v1222_v15 = vand.u32 2147483648, %v3586_v34  ;;  %vm1216_vm7 = vweird.f32 %v3586_v34  ;;  %v4293_v50 = vld [vmem:[#allocation10_spill] sm:$0xff] }
 0x1d5   : > { %1648 = vst [vmem:[%s3026_s17 + $0x128] sm:$0xff] %v1584_v14  ;;  %v1583_v24 = vmul.f32 %v4287_v0, %v1168_v43  ;;  %v1145_v55 = vadd.f32 %v2033_v30, %v1144_v59  ;;  %v1213_v31 = vsub.f32 1.0, %v1212_v63  ;;  %v1153_v45 = vor.u32 1.1754944e-38, %v1152_v6  ;;  %v3672_v10 = vpop.xlane.xlu0 %605 }
 0x1d6   : > { %v2037_v21 = vpop.eup %2036  ;;  %vm3646_vm9 = vcmp.eq.f32.partialorder %v1220_v47, 8.507059e+37  ;;  %v1206_v46 = vand.u32 2147483647, %v3604_v23  ;;  %2040 = vrcp.f32 %v3632_v58  ;;  %vm1217_vm10 = vweird.f32 %v2035_v35 }
 0x1d7   : > { %1647 = vst [vmem:[%s3026_s17 + $0x120] sm:$0xff] %v1583_v24  ;;  %v1149_v12 = vsel %vm1148_vm8, %v2033_v30, %v1145_v55  ;;  %v1214_v36 = vmul.f32 %v2035_v35, %v1213_v31  ;;  %v1198_v29 = vmul.f32 %v2037_v21, %v3604_v23  ;;  %v1223_v37 = vor.u32 1.1754944e-38, %v1222_v15  ;;  %vm1218_vm12 = vmor %vm1216_vm7, %vm1217_vm10  ;;  %v4296_v15 = vld [vmem:[#allocation13_spill] sm:$0xff] }
 0x1d8   : > { %v2039_v42 = vpop.eup %2038  ;;  %v1154_v41 = vsel %vm3637_vm6, %v1153_v45, %v1149_v12  ;;  %vm1202_vm11 = vweird.f32 %v3604_v23  ;;  %v1208_v57 = vand.u32 2147483648, %v3604_v23  ;;  %vm3664_vm13 = vcmp.eq.f32.partialorder %v1206_v46, 8.507059e+37  ;;  %v4299_v46 = vld [vmem:[#allocation14_spill] sm:$0xff] }
 0x1d9   : > { %v1582_v5 = vmul.f32 %v4290_v62, %v1154_v41  ;;  %v1215_v51 = vadd.f32 %v2035_v35, %v1214_v36  ;;  %v1199_v2 = vsub.f32 1.0, %v1198_v29  ;;  %v1184_v30 = vmul.f32 %v2039_v42, %v3611_v48 }
 0x1da   : > { %v1192_v56 = vand.u32 2147483647, %v3611_v48  ;;  %v1194_v8 = vand.u32 2147483648, %v3611_v48  ;;  %2042 = vrcp.f32 %v3654_v26  ;;  %vm1203_vm14 = vweird.f32 %v2037_v21 }
 0x1db   : > { %1646 = vst [vmem:[%s3026_s17 + $0x118] sm:$0xff] %v1582_v5  ;;  %v1219_v53 = vsel %vm1218_vm12, %v2035_v35, %v1215_v51  ;;  %v1200_v17 = vmul.f32 %v2037_v21, %v1199_v2  ;;  %v1185_v9 = vsub.f32 1.0, %v1184_v30  ;;  %v1209_v11 = vor.u32 1.1754944e-38, %v1208_v57  ;;  %v3679_v35 = vpop.xlane.xlu2 %615  ;;  %vm1204_vm1 = vmor %vm1202_vm11, %vm1203_vm14 }
 0x1dc   : > { %v2041_v34 = vpop.eup %2040  ;;  %v1224_v54 = vsel %vm3646_vm9, %v1223_v37, %v1219_v53  ;;  %vm1188_vm15 = vweird.f32 %v3611_v48  ;;  %vm1189_vm0 = vweird.f32 %v2039_v42  ;;  %vm3683_vm2 = vcmp.eq.f32.partialorder %v1192_v56, 8.507059e+37 }
 0x1dd   : > { %v1587_v1 = vmul.f32 %v4293_v50, %v1224_v54  ;;  %v1201_v27 = vadd.f32 %v2037_v21, %v1200_v17  ;;  %v1186_v4 = vmul.f32 %v2039_v42, %v1185_v9  ;;  %v1254_v6 = vmul.f32 %v2041_v34, %v3632_v58  ;;  %vm1190_vm3 = vmor %vm1188_vm15, %vm1189_vm0  ;;  %v3722_v51 = vpop.xlane.xlu0 %611 }
 0x1de   : > { %v1195_v47 = vor.u32 1.1754944e-38, %v1194_v8  ;;  %v1262_v61 = vand.u32 2147483647, %v3632_v58  ;;  %2044 = vrcp.f32 %v3672_v10  ;;  %v1264_v63 = vand.u32 2147483648, %v3632_v58  ;;  %v4302_v8 = vld [vmem:[#allocation17_spill] sm:$0xff] }
 0x1df   : > { %1651 = vst [vmem:[%s3026_s17 + $0x140] sm:$0xff] %v1587_v1  ;;  %v1205_v14 = vsel %vm1204_vm1, %v2037_v21, %v1201_v27  ;;  %v1187_v13 = vadd.f32 %v2039_v42, %v1186_v4  ;;  %v1255_v59 = vsub.f32 1.0, %v1254_v6  ;;  %vm1259_vm4 = vweird.f32 %v2041_v34  ;;  %v3700_v21 = vpop.xlane.xlu1 %613 }
 0x1e0   : > { %v2043_v43 = vpop.eup %2042  ;;  %v1210_v23 = vsel %vm3664_vm13, %v1209_v11, %v1205_v14  ;;  %v1248_v20 = vand.u32 2147483647, %v3654_v26  ;;  %2046 = vrcp.f32 %v3679_v35  ;;  %vm1258_vm5 = vweird.f32 %v3632_v58 }
 0x1e1   : > { %v1586_v0 = vmul.f32 %v4296_v15, %v1210_v23  ;;  %v1191_v24 = vsel %vm1190_vm3, %v2039_v42, %v1187_v13  ;;  %v1256_v55 = vmul.f32 %v2041_v34, %v1255_v59  ;;  %v1240_v31 = vmul.f32 %v2043_v43, %v3654_v26  ;;  %vm1260_vm8 = vmor %vm1258_vm5, %vm1259_vm4 }
 0x1e2   : > { %v1196_v45 = vsel %vm3683_vm2, %v1195_v47, %v1191_v24  ;;  %vm3705_vm6 = vcmp.eq.f32.partialorder %v1262_v61, 8.507059e+37  ;;  %v1250_v25 = vand.u32 2147483648, %v3654_v26  ;;  %vm1244_vm7 = vweird.f32 %v3654_v26  ;;  %v4305_v61 = vld [vmem:[#allocation18_spill] sm:$0xff] }
 0x1e3   : > { %1650 = vst [vmem:[%s3026_s17 + $0x138] sm:$0xff] %v1586_v0  ;;  %v1585_v12 = vmul.f32 %v4299_v46, %v1196_v45  ;;  %v1257_v36 = vadd.f32 %v2041_v34, %v1256_v55  ;;  %v1241_v29 = vsub.f32 1.0, %v1240_v31  ;;  %v1265_v41 = vor.u32 1.1754944e-38, %v1264_v63  ;;  %v3740_v6 = vpop.xlane.xlu2 %621 }
 0x1e4   : > { %v2045_v42 = vpop.eup %2044  ;;  %vm3714_vm9 = vcmp.eq.f32.partialorder %v1248_v20, 8.507059e+37  ;;  %v1234_v58 = vand.u32 2147483647, %v3672_v10  ;;  %2048 = vrcp.f32 %v3700_v21  ;;  %vm1245_vm10 = vweird.f32 %v2043_v43 }
 0x1e5   : > { %1649 = vst [vmem:[%s3026_s17 + $0x130] sm:$0xff] %v1585_v12  ;;  %v1261_v57 = vsel %vm1260_vm8, %v2041_v34, %v1257_v36  ;;  %v1242_v62 = vmul.f32 %v2043_v43, %v1241_v29  ;;  %v1226_v5 = vmul.f32 %v2045_v42, %v3672_v10  ;;  %v1251_v39 = vor.u32 1.1754944e-38, %v1250_v25  ;;  %vm1246_vm12 = vmor %vm1244_vm7, %vm1245_vm10  ;;  %v4308_v25 = vld [vmem:[#allocation15_spill] sm:$0xff] }
 0x1e6   : > { %v2047_v2 = vpop.eup %2046  ;;  %v1266_v30 = vsel %vm3705_vm6, %v1265_v41, %v1261_v57  ;;  %vm1230_vm11 = vweird.f32 %v3672_v10  ;;  %v1236_v56 = vand.u32 2147483648, %v3672_v10  ;;  %vm3732_vm13 = vcmp.eq.f32.partialorder %v1234_v58, 8.507059e+37  ;;  %v4311_v58 = vld [vmem:[#allocation20_spill] sm:$0xff] }
 0x1e7   : > { %v1590_v53 = vmul.f32 %v4302_v8, %v1266_v30  ;;  %v1243_v17 = vadd.f32 %v2043_v43, %v1242_v62  ;;  %v1227_v9 = vsub.f32 1.0, %v1226_v5  ;;  %v1296_v34 = vmul.f32 %v2047_v2, %v3679_v35 }
 0x1e8   : > { %v1304_v11 = vand.u32 2147483647, %v3679_v35  ;;  %v1306_v50 = vand.u32 2147483648, %v3679_v35  ;;  %2050 = vrcp.f32 %v3722_v51  ;;  %vm1231_vm14 = vweird.f32 %v2045_v42 }
 0x1e9   : > { %1654 = vst [vmem:[%s3026_s17 + $0x158] sm:$0xff] %v1590_v53  ;;  %v1247_v1 = vsel %vm1246_vm12, %v2043_v43, %v1243_v17  ;;  %v1228_v27 = vmul.f32 %v2045_v42, %v1227_v9  ;;  %v1297_v4 = vsub.f32 1.0, %v1296_v34  ;;  %v1237_v47 = vor.u32 1.1754944e-38, %v1236_v56  ;;  %v3747_v43 = vpop.xlane.xlu1 %619  ;;  %vm1232_vm1 = vmor %vm1230_vm11, %vm1231_vm14 }
 0x1ea   : > { %v2049_v26 = vpop.eup %2048  ;;  %v1252_v52 = vsel %vm3714_vm9, %v1251_v39, %v1247_v1  ;;  %vm1300_vm15 = vweird.f32 %v3679_v35  ;;  %vm1301_vm0 = vweird.f32 %v2047_v2  ;;  %vm3751_vm2 = vcmp.eq.f32.partialorder %v1304_v11, 8.507059e+37 }
 0x1eb   : > { %v1589_v14 = vmul.f32 %v4305_v61, %v1252_v52  ;;  %v1229_v13 = vadd.f32 %v2045_v42, %v1228_v27  ;;  %v1298_v59 = vmul.f32 %v2047_v2, %v1297_v4  ;;  %v1282_v63 = vmul.f32 %v2049_v26, %v3700_v21  ;;  %vm1302_vm3 = vmor %vm1300_vm15, %vm1301_vm0  ;;  %v3790_v17 = vpop.xlane.xlu2 %627 }
 0x1ec   : > { %v1307_v20 = vor.u32 1.1754944e-38, %v1306_v50  ;;  %v1290_v15 = vand.u32 2147483647, %v3700_v21  ;;  %2052 = vrcp.f32 %v3740_v6  ;;  %v1292_v31 = vand.u32 2147483648, %v3700_v21  ;;  %v4314_v50 = vld [vmem:[#allocation21_spill] sm:$0xff] }
 0x1ed   : > { %1653 = vst [vmem:[%s3026_s17 + $0x150] sm:$0xff] %v1589_v14  ;;  %v1233_v0 = vsel %vm1232_vm1, %v2045_v42, %v1229_v13  ;;  %v1299_v24 = vadd.f32 %v2047_v2, %v1298_v59  ;;  %v1283_v55 = vsub.f32 1.0, %v1282_v63  ;;  %vm1287_vm4 = vweird.f32 %v2049_v26  ;;  %v3768_v42 = vpop.xlane.xlu0 %617 }
 0x1ee   : > { %v2051_v45 = vpop.eup %2050  ;;  %v1238_v10 = vsel %vm3732_vm13, %v1237_v47, %v1233_v0  ;;  %v1276_v48 = vand.u32 2147483647, %v3722_v51  ;;  %2054 = vrcp.f32 %v3747_v43  ;;  %vm1286_vm5 = vweird.f32 %v3700_v21 }
 0x1ef   : > { %v1588_v46 = vmul.f32 %v4308_v25, %v1238_v10  ;;  %v1303_v12 = vsel %vm1302_vm3, %v2047_v2, %v1299_v24  ;;  %v1284_v36 = vmul.f32 %v2049_v26, %v1283_v55  ;;  %v1268_v29 = vmul.f32 %v2051_v45, %v3722_v51  ;;  %vm1288_vm8 = vmor %vm1286_vm5, %vm1287_vm4 }
 0x1f0   : > { %v1308_v41 = vsel %vm3751_vm2, %v1307_v20, %v1303_v12  ;;  %vm3773_vm6 = vcmp.eq.f32.partialorder %v1290_v15, 8.507059e+37  ;;  %v1278_v37 = vand.u32 2147483648, %v3722_v51  ;;  %vm1272_vm7 = vweird.f32 %v3722_v51  ;;  %v4317_v15 = vld [vmem:[#allocation16_spill] sm:$0xff] }
 0x1f1   : > { %1652 = vst [vmem:[%s3026_s17 + $0x148] sm:$0xff] %v1588_v46  ;;  %v1593_v57 = vmul.f32 %v4311_v58, %v1308_v41  ;;  %v1285_v62 = vadd.f32 %v2049_v26, %v1284_v36  ;;  %v1269_v5 = vsub.f32 1.0, %v1268_v29  ;;  %v1293_v30 = vor.u32 1.1754944e-38, %v1292_v31  ;;  %v3798_v52 = vpop.xlane.xlu1 %625 }
 0x1f2   : > { %v2053_v2 = vpop.eup %2052  ;;  %vm3782_vm9 = vcmp.eq.f32.partialorder %v1276_v48, 8.507059e+37  ;;  %v1346_v21 = vand.u32 2147483647, %v3740_v6  ;;  %2056 = vrcp.f32 %v3768_v42  ;;  %vm1273_vm10 = vweird.f32 %v2051_v45 }
 0x1f3   : > { %1657 = vst [vmem:[%s3026_s17 + $0x170] sm:$0xff] %v1593_v57  ;;  %v1289_v56 = vsel %vm1288_vm8, %v2049_v26, %v1285_v62  ;;  %v1270_v8 = vmul.f32 %v2051_v45, %v1269_v5  ;;  %v1338_v53 = vmul.f32 %v2053_v2, %v3740_v6  ;;  %v1279_v54 = vor.u32 1.1754944e-38, %v1278_v37  ;;  %vm1274_vm12 = vmor %vm1272_vm7, %vm1273_vm10  ;;  %v4320_v37 = vld [vmem:[#allocation22_spill] sm:$0xff] }
 0x1f4   : > { %v2055_v9 = vpop.eup %2054  ;;  %v1294_v34 = vsel %vm3773_vm6, %v1293_v30, %v1289_v56  ;;  %vm1342_vm11 = vweird.f32 %v3740_v6  ;;  %v1348_v11 = vand.u32 2147483648, %v3740_v6  ;;  %vm3802_vm13 = vcmp.eq.f32.partialorder %v1346_v21, 8.507059e+37  ;;  %v4323_v21 = vld [vmem:[#allocation23_spill] sm:$0xff] }
 0x1f5   : > { %v1592_v1 = vmul.f32 %v4314_v50, %v1294_v34  ;;  %v1271_v27 = vadd.f32 %v2051_v45, %v1270_v8  ;;  %v1339_v4 = vsub.f32 1.0, %v1338_v53  ;;  %v1324_v26 = vmul.f32 %v2055_v9, %v3747_v43  ;;  %v3815_v10 = vpop.xlane.xlu0 %623 }
 0x1f6   : > { %v1332_v61 = vand.u32 2147483647, %v3747_v43  ;;  %v1334_v14 = vand.u32 2147483648, %v3747_v43  ;;  %2058 = vrcp.f32 %v3790_v17  ;;  %vm1343_vm14 = vweird.f32 %v2053_v2 }
 0x1f7   : > { %1656 = vst [vmem:[%s3026_s17 + $0x168] sm:$0xff] %v1592_v1  ;;  %v1275_v13 = vsel %vm1274_vm12, %v2051_v45, %v1271_v27  ;;  %v1340_v59 = vmul.f32 %v2053_v2, %v1339_v4  ;;  %v1325_v63 = vsub.f32 1.0, %v1324_v26  ;;  %v1349_v20 = vor.u32 1.1754944e-38, %v1348_v11  ;;  %vm1344_vm1 = vmor %vm1342_vm11, %vm1343_vm14 }
 0x1f8   : > { %v2057_v23 = vpop.eup %2056  ;;  %v1280_v51 = vsel %vm3782_vm9, %v1279_v54, %v1275_v13  ;;  %vm1328_vm15 = vweird.f32 %v3747_v43  ;;  %vm1329_vm0 = vweird.f32 %v2055_v9  ;;  %vm3819_vm2 = vcmp.eq.f32.partialorder %v1332_v61, 8.507059e+37 }
 0x1f9   : > { %v1591_v0 = vmul.f32 %v4317_v15, %v1280_v51  ;;  %v1341_v24 = vadd.f32 %v2053_v2, %v1340_v59  ;;  %v1326_v55 = vmul.f32 %v2055_v9, %v1325_v63  ;;  %v1310_v31 = vmul.f32 %v2057_v23, %v3768_v42  ;;  %vm1330_vm3 = vmor %vm1328_vm15, %vm1329_vm0 }
 0x1fa   : > { %v1335_v48 = vor.u32 1.1754944e-38, %v1334_v14  ;;  %v1318_v25 = vand.u32 2147483647, %v3768_v42  ;;  %2060 = vrcp.f32 %v3798_v52  ;;  %v1320_v29 = vand.u32 2147483648, %v3768_v42  ;;  %v4326_v14 = vld [vmem:[#allocation19_spill] sm:$0xff] }
 0x1fb   : > { %1655 = vst [vmem:[%s3026_s17 + $0x160] sm:$0xff] %v1591_v0  ;;  %v1345_v46 = vsel %vm1344_vm1, %v2053_v2, %v1341_v24  ;;  %v1327_v12 = vadd.f32 %v2055_v9, %v1326_v55  ;;  %v1311_v36 = vsub.f32 1.0, %v1310_v31  ;;  %vm1315_vm4 = vweird.f32 %v2057_v23  ;;  %v3836_v2 = vpop.xlane.xlu2 %633 }
 0x1fc   : > { %v2059_v41 = vpop.eup %2058  ;;  %v1350_v6 = vsel %vm3802_vm13, %v1349_v20, %v1345_v46  ;;  %v1388_v35 = vand.u32 2147483647, %v3790_v17  ;;  %2062 = vrcp.f32 %v3815_v10  ;;  %vm1314_vm5 = vweird.f32 %v3768_v42 }
 0x1fd   : > { %v1596_v58 = vmul.f32 %v4320_v37, %v1350_v6  ;;  %v1331_v57 = vsel %vm1330_vm3, %v2055_v9, %v1327_v12  ;;  %v1312_v62 = vmul.f32 %v2057_v23, %v1311_v36  ;;  %v1380_v5 = vmul.f32 %v2059_v41, %v3790_v17  ;;  %v3849_v9 = vpop.xlane.xlu1 %631  ;;  %vm1316_vm8 = vmor %vm1314_vm5, %vm1315_vm4  ;;  %v3866_v51 = vpop.xlane.xlu0 %629 }
 0x1fe   : > { %v1336_v30 = vsel %vm3819_vm2, %v1335_v48, %v1331_v57  ;;  %vm3841_vm6 = vcmp.eq.f32.partialorder %v1318_v25, 8.507059e+37  ;;  %v1390_v39 = vand.u32 2147483648, %v3790_v17  ;;  %vm1384_vm7 = vweird.f32 %v3790_v17 }
 0x1ff   : > { %1660 = vst [vmem:[%s3026_s17 + $0x188] sm:$0xff] %v1596_v58  ;;  %v1595_v56 = vmul.f32 %v4323_v21, %v1336_v30  ;;  %v1313_v8 = vadd.f32 %v2057_v23, %v1312_v62  ;;  %v1381_v53 = vsub.f32 1.0, %v1380_v5  ;;  %v1321_v54 = vor.u32 1.1754944e-38, %v1320_v29 }
 0x200   : > { %v2061_v34 = vpop.eup %2060  ;;  %vm3852_vm9 = vcmp.eq.f32.partialorder %v1388_v35, 8.507059e+37  ;;  %v1374_v11 = vand.u32 2147483647, %v3798_v52  ;;  %2064 = vrcp.f32 %v3836_v2  ;;  %vm1385_vm10 = vweird.f32 %v2059_v41 }
 0x201   : > { %1659 = vst [vmem:[%s3026_s17 + $0x180] sm:$0xff] %v1595_v56  ;;  %v1317_v50 = vsel %vm1316_vm8, %v2057_v23, %v1313_v8  ;;  %v1382_v1 = vmul.f32 %v2059_v41, %v1381_v53  ;;  %v1366_v27 = vmul.f32 %v2061_v34, %v3798_v52  ;;  %v1391_v47 = vor.u32 1.1754944e-38, %v1390_v39  ;;  %vm1386_vm12 = vmor %vm1384_vm7, %vm1385_vm10 }
 0x202   : > { %v2063_v4 = vpop.eup %2062  ;;  %v1322_v26 = vsel %vm3841_vm6, %v1321_v54, %v1317_v50  ;;  %vm1370_vm11 = vweird.f32 %v3798_v52  ;;  %v1376_v61 = vand.u32 2147483648, %v3798_v52  ;;  %vm3870_vm13 = vcmp.eq.f32.partialorder %v1374_v11, 8.507059e+37 }
 0x203   : > { %v1594_v13 = vmul.f32 %v4326_v14, %v1322_v26  ;;  %v1383_v59 = vadd.f32 %v2059_v41, %v1382_v1  ;;  %v1367_v63 = vsub.f32 1.0, %v1366_v27  ;;  %v1352_v23 = vmul.f32 %v2063_v4, %v3815_v10  ;;  %v3883_v29 = vpop.xlane.xlu2 %639 }
 0x204   : > { %v1360_v15 = vand.u32 2147483647, %v3815_v10  ;;  %v1362_v0 = vand.u32 2147483648, %v3815_v10  ;;  %2066 = vrcp.f32 %v3849_v9  ;;  %vm1371_vm14 = vweird.f32 %v2061_v34 }
 0x205   : > { %1658 = vst [vmem:[%s3026_s17 + $0x178] sm:$0xff] %v1594_v13  ;;  %v1387_v24 = vsel %vm1386_vm12, %v2059_v41, %v1383_v59  ;;  %v1368_v55 = vmul.f32 %v2061_v34, %v1367_v63  ;;  %v1353_v31 = vsub.f32 1.0, %v1352_v23  ;;  %v1377_v48 = vor.u32 1.1754944e-38, %v1376_v61  ;;  %vm1372_vm1 = vmor %vm1370_vm11, %vm1371_vm14  ;;  %v3895_v62 = vpop.xlane.xlu1 %637  ;;  %v3912_v42 = vpop.xlane.xlu0 %635 }
 0x206   : > { %v2065_v45 = vpop.eup %2064  ;;  %v1392_v17 = vsel %vm3852_vm9, %v1391_v47, %v1387_v24  ;;  %vm1356_vm15 = vweird.f32 %v3815_v10  ;;  %vm1357_vm0 = vweird.f32 %v2063_v4  ;;  %vm3887_vm2 = vcmp.eq.f32.partialorder %v1360_v15, 8.507059e+37 }
 0x207   : > { %v1599_v25 = vmul.f32 %v2939_v40, %v1392_v17  ;;  %v1369_v46 = vadd.f32 %v2061_v34, %v1368_v55  ;;  %v1354_v12 = vmul.f32 %v2063_v4, %v1353_v31  ;;  %v1422_v36 = vmul.f32 %v2065_v45, %v3836_v2  ;;  %vm1358_vm3 = vmor %vm1356_vm15, %vm1357_vm0 }
 0x208   : > { %v1363_v6 = vor.u32 1.1754944e-38, %v1362_v0  ;;  %v1430_v35 = vand.u32 2147483647, %v3836_v2  ;;  %2068 = vrcp.f32 %v3866_v51  ;;  %v1432_v57 = vand.u32 2147483648, %v3836_v2 }
 0x209   : > { %1663 = vst [vmem:[%s3026_s17 + $0x1a0] sm:$0xff] %v1599_v25  ;;  %v1373_v40 = vsel %vm1372_vm1, %v2061_v34, %v1369_v46  ;;  %v1355_v37 = vadd.f32 %v2063_v4, %v1354_v12  ;;  %v1423_v58 = vsub.f32 1.0, %v1422_v36  ;;  %vm1427_vm4 = vweird.f32 %v2065_v45 }
 0x20a   : > { %v2067_v52 = vpop.eup %2066  ;;  %v1378_v5 = vsel %vm3870_vm13, %v1377_v48, %v1373_v40  ;;  %v1416_v30 = vand.u32 2147483647, %v3849_v9  ;;  %2070 = vrcp.f32 %v3883_v29  ;;  %vm1426_vm5 = vweird.f32 %v3836_v2 }
 0x20b   : > { %v1598_v43 = vmul.f32 %v2942_v49, %v1378_v5  ;;  %v1359_v39 = vsel %vm1358_vm3, %v2063_v4, %v1355_v37  ;;  %v1424_v21 = vmul.f32 %v2065_v45, %v1423_v58  ;;  %v1408_v56 = vmul.f32 %v2067_v52, %v3849_v9  ;;  %vm1428_vm7 = vmor %vm1426_vm5, %vm1427_vm4  ;;  %v3934_v24 = vpop.xlane.xlu2 %645 }
 0x20c   : > { %v1364_v8 = vsel %vm3887_vm2, %v1363_v6, %v1359_v39  ;;  %v1418_v10 = vand.u32 2147483648, %v3849_v9  ;;  %vm1431_vm6 = vcmp.eq.f32.partialorder %v1430_v35, 8.507059e+37  ;;  %v1433_v11 = vor.u32 1.1754944e-38, %v1432_v57 }
 0x20d   : > { %1662 = vst [vmem:[%s3026_s17 + $0x198] sm:$0xff] %v1598_v43  ;;  %v1597_v53 = vmul.f32 %v2923_v28, %v1364_v8  ;;  %v1425_v34 = vadd.f32 %v2065_v45, %v1424_v21  ;;  %v1409_v54 = vsub.f32 1.0, %v1408_v56  ;;  %vm1412_vm8 = vweird.f32 %v3849_v9  ;;  %v3936_v55 = vpop.xlane.xlu1 %643  ;;  %v3956_v37 = vpop.xlane.xlu0 %641 }
 0x20e   : > { %v2069_v49 = vpop.eup %2068  ;;  %vm3916_vm9 = vcmp.eq.f32.partialorder %v1416_v30, 8.507059e+37  ;;  %2072 = vrcp.f32 %v3895_v62  ;;  %vm1413_vm10 = vweird.f32 %v2067_v52  ;;  %v1419_v26 = vor.u32 1.1754944e-38, %v1418_v10 }
 0x20f   : > { %1661 = vst [vmem:[%s3026_s17 + $0x190] sm:$0xff] %v1597_v53  ;;  %v1429_v2 = vsel %vm1428_vm7, %v2065_v45, %v1425_v34  ;;  %v1410_v28 = vmul.f32 %v2067_v52, %v1409_v54  ;;  %v1394_v1 = vmul.f32 %v2069_v49, %v3866_v51  ;;  %v1402_v47 = vand.u32 2147483647, %v3866_v51  ;;  %vm1414_vm11 = vmor %vm1412_vm8, %vm1413_vm10 }
 0x210   : > { %v2071_v27 = vpop.eup %2070  ;;  %v1434_v4 = vsel %vm1431_vm6, %v1433_v11, %v1429_v2  ;;  %v1404_v61 = vand.u32 2147483648, %v3866_v51  ;;  %vm1398_vm12 = vweird.f32 %v3866_v51  ;;  %v1472_v23 = vand.u32 2147483647, %v3883_v29 }
 0x211   : > { %v1602_v14 = vmul.f32 %v2948_v22, %v1434_v4  ;;  %v1411_v13 = vadd.f32 %v2067_v52, %v1410_v28  ;;  %v1395_v59 = vsub.f32 1.0, %v1394_v1  ;;  %v1464_v63 = vmul.f32 %v2071_v27, %v3883_v29 }
 0x212   : > { %v1474_v20 = vand.u32 2147483648, %v3883_v29  ;;  %2074 = vrcp.f32 %v3912_v42  ;;  %vm1399_vm13 = vweird.f32 %v2069_v49  ;;  %vm3940_vm14 = vcmp.eq.f32.partialorder %v1402_v47, 8.507059e+37 }
 0x213   : > { %1666 = vst [vmem:[%s3026_s17 + $0x1b8] sm:$0xff] %v1602_v14  ;;  %v1415_v15 = vsel %vm1414_vm11, %v2067_v52, %v1411_v13  ;;  %v1396_v0 = vmul.f32 %v2069_v49, %v1395_v59  ;;  %v1465_v22 = vsub.f32 1.0, %v1464_v63  ;;  %v1405_v17 = vor.u32 1.1754944e-38, %v1404_v61  ;;  %vm1400_vm0 = vmor %vm1398_vm12, %vm1399_vm13 }
 0x214   : > { %v2073_v9 = vpop.eup %2072  ;;  %v1420_v31 = vsel %vm3916_vm9, %v1419_v26, %v1415_v15  ;;  %vm1469_vm15 = vweird.f32 %v2071_v27  ;;  %vm1468_vm1 = vweird.f32 %v3883_v29  ;;  %vm3949_vm2 = vcmp.eq.f32.partialorder %v1472_v23, 8.507059e+37 }
 0x215   : > { %v1601_v48 = vmul.f32 %v2957_v60, %v1420_v31  ;;  %v1397_v25 = vadd.f32 %v2069_v49, %v1396_v0  ;;  %v1466_v46 = vmul.f32 %v2071_v27, %v1465_v22  ;;  %v1450_v12 = vmul.f32 %v2073_v9, %v3895_v62  ;;  %vm1470_vm3 = vmor %vm1468_vm1, %vm1469_vm15  ;;  %v3993_v63 = vpop.xlane.xlu0 %647 }
 0x216   : > { %v1475_v41 = vor.u32 1.1754944e-38, %v1474_v20  ;;  %2076 = vrcp.f32 %v3934_v24  ;;  %v1458_v40 = vand.u32 2147483647, %v3895_v62  ;;  %vm1455_vm4 = vweird.f32 %v2073_v9 }
 0x217   : > { %1665 = vst [vmem:[%s3026_s17 + $0x1b0] sm:$0xff] %v1601_v48  ;;  %v1401_v6 = vsel %vm1400_vm0, %v2069_v49, %v1397_v25  ;;  %v1467_v35 = vadd.f32 %v2071_v27, %v1466_v46  ;;  %v1451_v60 = vsub.f32 1.0, %v1450_v12  ;;  %v1460_v58 = vand.u32 2147483648, %v3895_v62 }
 0x218   : > { %v2075_v51 = vpop.eup %2074  ;;  %v1406_v29 = vsel %vm3940_vm14, %v1405_v17, %v1401_v6  ;;  %2078 = vrcp.f32 %v3936_v55  ;;  %v1444_v39 = vand.u32 2147483647, %v3912_v42  ;;  %v1446_v21 = vand.u32 2147483648, %v3912_v42 }
 0x219   : > { %v1600_v57 = vmul.f32 %v2936_v18, %v1406_v29  ;;  %v1471_v52 = vsel %vm1470_vm3, %v2071_v27, %v1467_v35  ;;  %v1452_v5 = vmul.f32 %v2073_v9, %v1451_v60  ;;  %v1436_v30 = vmul.f32 %v2075_v51, %v3912_v42 }
 0x21a   : > { %v1476_v43 = vsel %vm3949_vm2, %v1475_v41, %v1471_v52  ;;  %vm1454_vm5 = vweird.f32 %v3895_v62  ;;  %vm1459_vm7 = vcmp.eq.f32.partialorder %v1458_v40, 8.507059e+37  ;;  %v1461_v53 = vor.u32 1.1754944e-38, %v1460_v58 }
 0x21b   : > { %1664 = vst [vmem:[%s3026_s17 + $0x1a8] sm:$0xff] %v1600_v57  ;;  %v1605_v56 = vmul.f32 %v2970_v16, %v1476_v43  ;;  %v1453_v8 = vadd.f32 %v2073_v9, %v1452_v5  ;;  %v1437_v10 = vsub.f32 1.0, %v1436_v30  ;;  %vm1456_vm6 = vmor %vm1454_vm5, %vm1455_vm4  ;;  %vm1440_vm8 = vweird.f32 %v3912_v42  ;;  %v3977_v16 = vpop.xlane.xlu1 %649 }
 0x21c   : > { %v2077_v18 = vpop.eup %2076  ;;  %2080 = vrcp.f32 %v3956_v37  ;;  %vm1441_vm9 = vweird.f32 %v2075_v51  ;;  %vm3979_vm10 = vcmp.eq.f32.partialorder %v1444_v39, 8.507059e+37  ;;  %v1447_v2 = vor.u32 1.1754944e-38, %v1446_v21 }
 0x21d   : > { %1669 = vst [vmem:[%s3026_s17 + $0x1d0] sm:$0xff] %v1605_v56  ;;  %v1457_v34 = vsel %vm1456_vm6, %v2073_v9, %v1453_v8  ;;  %v1438_v54 = vmul.f32 %v2075_v51, %v1437_v10  ;;  %v1506_v49 = vmul.f32 %v2077_v18, %v3934_v24  ;;  %v1514_v28 = vand.u32 2147483647, %v3934_v24  ;;  %vm1442_vm11 = vmor %vm1440_vm8, %vm1441_vm9 }
 0x21e   : > { %v2079_v62 = vpop.eup %2078  ;;  %v1462_v11 = vsel %vm1459_vm7, %v1461_v53, %v1457_v34  ;;  %v1516_v47 = vand.u32 2147483648, %v3934_v24  ;;  %v1500_v61 = vand.u32 2147483647, %v3936_v55  ;;  %v1502_v14 = vand.u32 2147483648, %v3936_v55 }
 0x21f   : > { %v1604_v1 = vmul.f32 %v2973_v7, %v1462_v11  ;;  %v1439_v27 = vadd.f32 %v2075_v51, %v1438_v54  ;;  %v1507_v4 = vsub.f32 1.0, %v1506_v49  ;;  %v1492_v26 = vmul.f32 %v2079_v62, %v3936_v55 }
 0x220   : > { %2082 = vrcp.f32 %v3977_v16  ;;  %vm1511_vm12 = vweird.f32 %v2077_v18  ;;  %vm1510_vm13 = vweird.f32 %v3934_v24  ;;  %vm3998_vm14 = vcmp.eq.f32.partialorder %v1514_v28, 8.507059e+37 }
 0x221   : > { %1668 = vst [vmem:[%s3026_s17 + $0x1c8] sm:$0xff] %v1604_v1  ;;  %v1443_v13 = vsel %vm1442_vm11, %v2075_v51, %v1439_v27  ;;  %v1508_v59 = vmul.f32 %v2077_v18, %v1507_v4  ;;  %v1493_v7 = vsub.f32 1.0, %v1492_v26  ;;  %vm1497_vm15 = vweird.f32 %v2079_v62  ;;  %vm1512_vm0 = vmor %vm1510_vm13, %vm1511_vm12 }
 0x222   : > { %v2081_v23 = vpop.eup %2080  ;;  %v1448_v42 = vsel %vm3979_vm10, %v1447_v2, %v1443_v13  ;;  %v1517_v31 = vor.u32 1.1754944e-38, %v1516_v47  ;;  %vm1496_vm1 = vweird.f32 %v3936_v55  ;;  %vm4005_vm2 = vcmp.eq.f32.partialorder %v1500_v61, 8.507059e+37 }
 0x223   : > { %v1603_v15 = vmul.f32 %v2944_v44, %v1448_v42  ;;  %v1509_v0 = vadd.f32 %v2077_v18, %v1508_v59  ;;  %v1494_v22 = vmul.f32 %v2079_v62, %v1493_v7  ;;  %v1478_v9 = vmul.f32 %v2081_v23, %v3956_v37  ;;  %vm1498_vm3 = vmor %vm1496_vm1, %vm1497_vm15 }
 0x224   : > { %2084 = vrcp.f32 %v3993_v63  ;;  %v1503_v48 = vor.u32 1.1754944e-38, %v1502_v14  ;;  %vm1483_vm4 = vweird.f32 %v2081_v23  ;;  %v1486_v55 = vand.u32 2147483647, %v3956_v37 }
 0x225   : > { %1667 = vst [vmem:[%s3026_s17 + $0x1c0] sm:$0xff] %v1603_v15  ;;  %v1513_v24 = vsel %vm1512_vm0, %v2077_v18, %v1509_v0  ;;  %v1495_v17 = vadd.f32 %v2079_v62, %v1494_v22  ;;  %v1479_v44 = vsub.f32 1.0, %v1478_v9  ;;  %v1488_v12 = vand.u32 2147483648, %v3956_v37 }
 0x226   : > { %v2083_v25 = vpop.eup %2082  ;;  %v1518_v46 = vsel %vm3998_vm14, %v1517_v31, %v1513_v24  ;;  %vm1482_vm5 = vweird.f32 %v3956_v37  ;;  %vm1487_vm7 = vcmp.eq.f32.partialorder %v1486_v55, 8.507059e+37  ;;  %v1542_v57 = vand.u32 2147483647, %v3977_v16 }
 0x227   : > { %v1608_v36 = vmul.f32 %v2985_v19, %v1518_v46  ;;  %v1499_v41 = vsel %vm1498_vm3, %v2079_v62, %v1495_v17  ;;  %v1480_v6 = vmul.f32 %v2081_v23, %v1479_v44  ;;  %v1534_v35 = vmul.f32 %v2083_v25, %v3977_v16  ;;  %vm1484_vm6 = vmor %vm1482_vm5, %vm1483_vm4 }
 0x228   : > { %v1504_v60 = vsel %vm4005_vm2, %v1503_v48, %v1499_v41  ;;  %v1489_v19 = vor.u32 1.1754944e-38, %v1488_v12  ;;  %v1544_v52 = vand.u32 2147483648, %v3977_v16  ;;  %vm1539_vm8 = vweird.f32 %v2083_v25 }
 0x229   : > { %1672 = vst [vmem:[%s3026_s17 + $0x1e8] sm:$0xff] %v1608_v36  ;;  %v1607_v40 = vmul.f32 %v3006_v38, %v1504_v60  ;;  %v1481_v51 = vadd.f32 %v2081_v23, %v1480_v6  ;;  %v1535_v29 = vsub.f32 1.0, %v1534_v35  ;;  %vm1538_vm9 = vweird.f32 %v3977_v16 }
 0x22a   : > { %v2085_v58 = vpop.eup %2084  ;;  %vm1540_vm10 = vmor %vm1538_vm9, %vm1539_vm8  ;;  %vm1543_vm11 = vcmp.eq.f32.partialorder %v1542_v57, 8.507059e+37  ;;  %v1545_v56 = vor.u32 1.1754944e-38, %v1544_v52  ;;  %v1530_v8 = vand.u32 2147483648, %v3993_v63  ;;  %vm1524_vm13 = vweird.f32 %v3993_v63 }
 0x22b   : > { %1671 = vst [vmem:[%s3026_s17 + $0x1e0] sm:$0xff] %v1607_v40  ;;  %v1485_v5 = vsel %vm1484_vm6, %v2081_v23, %v1481_v51  ;;  %v1536_v30 = vmul.f32 %v2083_v25, %v1535_v29  ;;  %v1520_v43 = vmul.f32 %v2085_v58, %v3993_v63  ;;  %vm1525_vm12 = vweird.f32 %v2085_v58 }
 0x22c   : > { %v1490_v38 = vsel %vm1487_vm7, %v1489_v19, %v1485_v5  ;;  %vm1526_vm14 = vmor %vm1524_vm13, %vm1525_vm12  ;;  %v1531_v49 = vor.u32 1.1754944e-38, %v1530_v8 }
 0x22d   : > { %v1606_v37 = vmul.f32 %v2965_v33, %v1490_v38  ;;  %v1537_v39 = vadd.f32 %v2083_v25, %v1536_v30  ;;  %v1521_v21 = vsub.f32 1.0, %v1520_v43  ;;  %v1528_v33 = vand.u32 2147483647, %v3993_v63 }
 0x22f   : > { %1670 = vst [vmem:[%s3026_s17 + $0x1d8] sm:$0xff] %v1606_v37  ;;  %v1541_v10 = vsel %vm1540_vm10, %v2083_v25, %v1537_v39  ;;  %v1522_v18 = vmul.f32 %v2085_v58, %v1521_v21  ;;  %vm1529_vm15 = vcmp.eq.f32.partialorder %v1528_v33, 8.507059e+37 }
 0x230   : > { %v1546_v53 = vsel %vm1543_vm11, %v1545_v56, %v1541_v10 }
 0x231   : > { %v1610_v34 = vmul.f32 %v3031_v32, %v1546_v53  ;;  %v1523_v54 = vadd.f32 %v2085_v58, %v1522_v18 }
 0x233   : > { %1674 = vst [vmem:[%s3026_s17 + $0x1f8] sm:$0xff] %v1610_v34  ;;  %v1527_v16 = vsel %vm1526_vm14, %v2085_v58, %v1523_v54 }
 0x234   : > { %v1532_v62 = vsel %vm1529_vm15, %v1531_v49, %v1527_v16 }
 0x235   : > { %v1609_v11 = vmul.f32 %v2977_v3, %v1532_v62 }
 0x237   : > { %1673 = vst [vmem:[%s3026_s17 + $0x1f0] sm:$0xff] %v1609_v11 }
 0x238   : > { %2143 = shalt.err (!%p2140_p4)
}
 0x239   : > { %s2186_s16 = smov 128   ;;  %s2187_s20 = smov 8  }
 0x23a   : > { %1782 = dma.vmem_to_hbm [thread:$0]  (%p2248_p11), %s1689_s10, 8192, %s1691_s29, %s1676_s30, %s2186_s16, %s2186_s16, %s2187_s20  }
 0x23b PF: > { %s1705_s21 = sand.u32 1, %s2170_s6   ;;  %p4343_p7 = scmp.ge.s32.totalorder %s2182_s9, 2 }
 0x23c   : > { %s1706_s22 = scalar_lea.sflag [#allocation4], %s1705_s21 }
 0x23d   : > { %p1789_p5 = pnand %p4343_p7, %p2252_p12 }
 0x23f   : > { %p1790_p8 = pneg %p1789_p5 }
 0x241   : > { %2165 = dma.done.wait (%p1790_p8), %s1706_s22, 8192  }
 0x242   : > { %2167 = vsyncadd (%p1790_p8), %s1706_s22, 4294959104  ;;  %p14_p10 = scmp.ge.s32.totalorder %s2223_s12, 4   ;;  %s4344_s6 = smov %s2174_s7 }
 0x243   : > { %s4345_s7 = smov %s2178_s8  ;;  %s4346_s8 = smov %s2235_s15 }
 0x244   : > { %s4347_s9 = smov %s2223_s12  ;;  %16 = sbr.rel (!%p14_p10) target bundleno = 5 (0x5), region = 69 }
 0x249   :  { %1712 = vsyncpa [#allocation3], 1 }
 0x24a   :  { %1714 = vsyncpa [#allocation3 + $0x1], 1 }
 0x24b   :  { %1715 = vsyncpa [#allocation4], 1 }
 0x24c   :  { %1717 = vsyncpa [#allocation4 + $0x1], 1 }

</bundles_post_ra>
